<compile_context>
chip_gen: v7x
topology: tpu7x:2x2x1
jax: 0.10.0
libtpu: 0.0.40
codegen_flags: <defaults>
</compile_context>

<pallas_src>
import functools

import jax
import jax.numpy as jnp
from jax.experimental import pallas as pl
from jax.experimental.pallas import tpu as pltpu

EPS = 1.1920929e-07  # torch.finfo(torch.float32).eps

# MXU input dtype for the 1x1 / pointwise / mask matmuls. bf16 is MXU-native
# on v5e/v6e/v7x (v7x has no f32 MXU path at all); accumulation is f32 via
# preferred_element_type.
MATMUL_DTYPE = jnp.bfloat16


def _round_up(x, m):
    return (x + m - 1) // m * m


# ----------------------------------------------------------------------------
# Kernels (each grid step handles one batch element: full [C, K_pad] tile)
# ----------------------------------------------------------------------------


def _make_cln_bottleneck_kernel(K_true, K_pad):
    """cLN(N) fused with the bottleneck 1x1 conv (N -> B)."""

    def kernel(w_ref, g_ref, b_ref, x_ref, o_ref):
        x = x_ref[0]                                              # [N, Kp]
        mean = jnp.mean(x, axis=0, keepdims=True)                 # [1, Kp]
        var = jnp.maximum(
            jnp.mean(x * x, axis=0, keepdims=True) - mean * mean, 0.0)
        y = g_ref[0] * (x - mean) * jax.lax.rsqrt(var + EPS) + b_ref[0]
        # zero the padded time lanes so downstream gLN stats / convs stay exact
        mask = (jax.lax.broadcasted_iota(jnp.int32, (1, K_pad), 1)
                < K_true).astype(jnp.float32)
        y = y * mask
        o_ref[0] = jnp.dot(w_ref[...],                            # bf16 weight
                           y.astype(MATMUL_DTYPE),
                           preferred_element_type=jnp.float32)

    return kernel


def _make_repeat_kernel(P, X, K_true, K_pad, H):
    """One full repeat = X fused TemporalBlocks (dilations 1, 2, ..., 2^(X-1)).

    Per block: 1x1 conv -> PReLU -> gLN -> dilated depthwise conv -> PReLU
    -> gLN -> pointwise conv -> +residual.  The [B, K] activation and all
    [H, K] intermediates stay in VMEM for the whole repeat.
    """
    dilations = [2 ** xi for xi in range(X)]
    inv_cnt = 1.0 / float(H * K_true)

    def kernel(alpha_ref,                        # SMEM (X, 2) PReLU alphas
               w1s_ref, g1s_ref, b1s_ref,        # [X,H,B] bf16, [X,H,1] f32 x2
               dws_ref, g2s_ref, b2s_ref,        # [X,H,P] f32, [X,H,1] f32 x2
               pws_ref,                          # [X,B,H] bf16
               x_ref, o_ref):                    # [1,B,Kp] f32 in / out (aliased)
        x = x_ref[0]                                              # [B, Kp]
        lane = jax.lax.broadcasted_iota(jnp.int32, (1, K_pad), 1)
        mask = (lane < K_true).astype(jnp.float32)                # [1, Kp]

        for xi in range(X):
            d = dilations[xi]
            pad = (P - 1) * d // 2
            a1 = alpha_ref[xi, 0]
            a2 = alpha_ref[xi, 1]

            # ---- 1x1 conv (B -> H) on MXU, bf16 in / f32 acc ----
            y = jnp.dot(w1s_ref[xi], x.astype(MATMUL_DTYPE),
                        preferred_element_type=jnp.float32)       # [H, Kp]
            y = jnp.where(y >= 0.0, y, a1 * y)                    # PReLU
            # gLN #1: y's padded lanes are exactly zero (x padded lanes are
            # zero, PReLU(0)=0), so the stats need no mask.
            mean1 = jnp.sum(y) * inv_cnt
            var1 = jnp.maximum(jnp.sum(y * y) * inv_cnt - mean1 * mean1, 0.0)
            s1 = g1s_ref[xi] * jax.lax.rsqrt(var1 + EPS)          # [H, 1]
            t1 = b1s_ref[xi] - mean1 * s1                         # [H, 1]
            z = (s1 * y + t1) * mask                              # [H, Kp]

            # ---- dilated depthwise conv via XLU rolls + boundary masks ----
            dw = dws_ref[xi]                                      # [H, P]
            acc = None
            for p in range(P):
                off = p * d - pad
                if off == 0:
                    term = dw[:, p:p + 1] * z
                else:
                    zs = pltpu.roll(z, shift=(-off) % K_pad, axis=1)
                    if off > 0:
                        valid = (lane < (K_pad - off)).astype(jnp.float32)
                    else:
                        valid = (lane >= -off).astype(jnp.float32)
                    term = dw[:, p:p + 1] * (zs * valid)
                acc = term if acc is None else acc + term

            # ---- PReLU -> gLN #2 (padded lanes can bleed -> masked stats) ----
            acc = jnp.where(acc >= 0.0, acc, a2 * acc)
            am = acc * mask
            mean2 = jnp.sum(am) * inv_cnt
            var2 = jnp.maximum(jnp.sum(am * am) * inv_cnt - mean2 * mean2, 0.0)
            s2 = g2s_ref[xi] * jax.lax.rsqrt(var2 + EPS)
            t2 = b2s_ref[xi] - mean2 * s2
            z2 = (s2 * acc + t2) * mask                           # [H, Kp]

            # ---- pointwise conv (H -> B) + residual (padded lanes stay 0) ----
            x = jnp.dot(pws_ref[xi], z2.astype(MATMUL_DTYPE),
                        preferred_element_type=jnp.float32) + x

        o_ref[0] = x

    return kernel


def _mask_conv_relu_kernel(w_ref, x_ref, o_ref):
    y = jnp.dot(w_ref[...], x_ref[0].astype(MATMUL_DTYPE),
                preferred_element_type=jnp.float32)
    o_ref[0] = jnp.maximum(y, 0.0)


# ----------------------------------------------------------------------------
# pallas_call wrappers
# ----------------------------------------------------------------------------


def _cparams():
    # batch axis is embarrassingly parallel -> lets v7x split it over its 2 TCs.
    # 56 MiB scoped VMEM is above every generation's default (16/32/32 MiB)
    # and below v7x's 64 MiB physical budget.
    return pltpu.CompilerParams(
        dimension_semantics=("parallel",),
        vmem_limit_bytes=56 * 1024 * 1024)


def _full3(C, K):
    return pl.BlockSpec((1, C, K), lambda m: (m, 0, 0))


def _rep3(X, C, K):
    return pl.BlockSpec((X, C, K), lambda m: (0, 0, 0))


def _rep2(r, c):
    return pl.BlockSpec((r, c), lambda m: (0, 0))


def pallas_cln_bottleneck(w, gamma, beta, x, K_true):
    M, N, K_pad = x.shape
    Bc = w.shape[0]
    return pl.pallas_call(
        _make_cln_bottleneck_kernel(K_true, K_pad),
        out_shape=jax.ShapeDtypeStruct((M, Bc, K_pad), jnp.float32),
        grid=(M,),
        in_specs=[_rep2(Bc, N), _rep3(1, N, 1), _rep3(1, N, 1),
                  _full3(N, K_pad)],
        out_specs=_full3(Bc, K_pad),
        compiler_params=_cparams(),
        cost_estimate=pl.CostEstimate(
            flops=2 * M * Bc * N * K_true + 8 * M * N * K_pad,
            transcendentals=M * K_pad,
            bytes_accessed=M * (N + Bc) * K_pad * 4 + Bc * N * 2),
    )(w, gamma, beta, x)


def pallas_repeat(rep, x, *, P, X, K_true):
    """Run one repeat (X fused TemporalBlocks) as a single pallas_call."""
    M, Bc, K_pad = x.shape
    H = rep["w1s"].shape[1]
    kernel = _make_repeat_kernel(P, X, K_true, K_pad, H)
    flops = 2 * M * X * K_true * (2 * H * Bc + H * P) + 14 * M * X * H * K_pad
    bytes_accessed = (2 * M * Bc * K_pad * 4
                      + 2 * X * H * Bc * 2 + X * H * (P + 4) * 4)
    return pl.pallas_call(
        kernel,
        out_shape=jax.ShapeDtypeStruct((M, Bc, K_pad), jnp.float32),
        grid=(M,),
        in_specs=[
            pl.BlockSpec(memory_space=pltpu.MemorySpace.SMEM),  # alphas (X, 2)
            _rep3(X, H, Bc),                                    # w1s (bf16)
            _rep3(X, H, 1), _rep3(X, H, 1),                     # g1s, b1s
            _rep3(X, H, P),                                     # depthwise w
            _rep3(X, H, 1), _rep3(X, H, 1),                     # g2s, b2s
            _rep3(X, Bc, H),                                    # pws (bf16)
            _full3(Bc, K_pad),                                  # x (residual)
        ],
        out_specs=_full3(Bc, K_pad),
        input_output_aliases={8: 0},   # write the repeat output in place of x
        compiler_params=_cparams(),
        cost_estimate=pl.CostEstimate(flops=flops, transcendentals=2 * M * X,
                                      bytes_accessed=bytes_accessed),
    )(rep["alphas"], rep["w1s"], rep["g1s"], rep["b1s"], rep["dws"],
      rep["g2s"], rep["b2s"], rep["pws"], x)


def pallas_mask_conv_relu(w, x):
    M, Bc, K_pad = x.shape
    Cout = w.shape[0]
    return pl.pallas_call(
        _mask_conv_relu_kernel,
        out_shape=jax.ShapeDtypeStruct((M, Cout, K_pad), jnp.float32),
        grid=(M,),
        in_specs=[_rep2(Cout, Bc), _full3(Bc, K_pad)],
        out_specs=_full3(Cout, K_pad),
        compiler_params=_cparams(),
        cost_estimate=pl.CostEstimate(
            flops=2 * M * Cout * Bc * K_pad,
            transcendentals=0,
            bytes_accessed=M * (Bc + Cout) * K_pad * 4 + Cout * Bc * 2),
    )(w, x)


# ----------------------------------------------------------------------------
# Model: parameter construction + forward
# ----------------------------------------------------------------------------


def init_params(key, N, B, H, P, X, R, C):
    def uinit(k, shape, fan_in, dtype=jnp.float32):
        bound = 1.0 / jnp.sqrt(jnp.float32(fan_in))
        return jax.random.uniform(k, shape, jnp.float32,
                                  -bound, bound).astype(dtype)

    keys = iter(jax.random.split(key, 2 + R * X * 3))
    params = {
        "ln_gamma": jnp.ones((1, N, 1), jnp.float32),
        "ln_beta": jnp.zeros((1, N, 1), jnp.float32),
        "bottleneck_w": uinit(next(keys), (B, N), N, MATMUL_DTYPE),   # Conv1d(N,B,1)
        "mask_w": uinit(next(keys), (C * N, B), B, MATMUL_DTYPE),     # Conv1d(B,C*N,1)
        "repeats": [],
    }
    for _ in range(R):
        w1s, dws, pws = [], [], []
        for _ in range(X):
            w1s.append(uinit(next(keys), (H, B), B, MATMUL_DTYPE))    # Conv1d(B,H,1)
            dws.append(uinit(next(keys), (H, P), P))                  # depthwise
            pws.append(uinit(next(keys), (B, H), H, MATMUL_DTYPE))    # Conv1d(H,B,1)
        rep = {
            "alphas": jnp.full((X, 2), 0.25, jnp.float32),            # PReLU x2/block
            "w1s": jnp.stack(w1s),                                    # [X,H,B] bf16
            "g1s": jnp.ones((X, H, 1), jnp.float32),
            "b1s": jnp.zeros((X, H, 1), jnp.float32),
            "dws": jnp.stack(dws),                                    # [X,H,P] f32
            "g2s": jnp.ones((X, H, 1), jnp.float32),
            "b2s": jnp.zeros((X, H, 1), jnp.float32),
            "pws": jnp.stack(pws),                                    # [X,B,H] bf16
        }
        params["repeats"].append(rep)
    return params


def temporal_conv_net_forward(mixture_w, params, *, P, X, R, C):
    """mixture_w: [M, N, K] -> est_mask: [M, C, N, K]  (mask_nonlinear='relu')"""
    M, N, K = mixture_w.shape
    for xi in range(X):
        if ((P - 1) * (2 ** xi)) % 2 != 0:
            # PyTorch's non-causal padding (P-1)*d//2 does not preserve length
            # here; the reference module itself would fail the residual add.
            raise ValueError(
                f"(P-1)*dilation must be even for 'same' non-causal padding; "
                f"got P={P}, dilation={2 ** xi}")

    # Pad the time axis once to a lane-dense multiple of 128; cropped at the
    # end. In-kernel masks keep the gLN statistics exact w.r.t. the true K.
    K_pad = _round_up(K, 128)
    x_in = jnp.pad(mixture_w, ((0, 0), (0, 0), (0, K_pad - K)))

    x = pallas_cln_bottleneck(params["bottleneck_w"], params["ln_gamma"],
                              params["ln_beta"], x_in, K)          # [M, B, Kp]
    for r in range(R):
        x = pallas_repeat(params["repeats"][r], x, P=P, X=X, K_true=K)
    score = pallas_mask_conv_relu(params["mask_w"], x)             # [M, C*N, Kp]
    est_mask = score[:, :, :K].reshape(M, C, N, K)
    return est_mask


# ----------------------------------------------------------------------------


if __name__ == "__main__":
    # Small config: N filters, B bottleneck, H conv channels, P kernel size,
    # X blocks per repeat, R repeats, C speakers.
    M, N, B, H, P, X, R, C = 2, 8, 8, 8, 3, 2, 2, 2
    K = 16

    key = jax.random.PRNGKey(0)
    k_in, k_par = jax.random.split(key)
    mixture_w = jax.random.normal(k_in, (M, N, K), jnp.float32)
    params = init_params(k_par, N, B, H, P, X, R, C)

    fwd = jax.jit(functools.partial(temporal_conv_net_forward, P=P, X=X, R=R, C=C))
    est_mask = fwd(mixture_w, params)
    est_mask = jax.block_until_ready(est_mask)

    assert est_mask.shape == (M, C, N, K), est_mask.shape
    assert bool(jnp.all(jnp.isfinite(est_mask)))
    print("KERNEL_OK")
</pallas_src>

<mosaic_0001>
module attributes {stable_mosaic.version = 11 : i64} {
  func.func @kernel(%arg0: i32, %arg1: memref<8x8xbf16, #tpu.memory_space<vmem>>, %arg2: memref<1x8x1xf32, #tpu.memory_space<vmem>>, %arg3: memref<1x8x1xf32, #tpu.memory_space<vmem>>, %arg4: memref<1x8x128xf32, #tpu.memory_space<vmem>>, %arg5: memref<1x8x128xf32, #tpu.memory_space<vmem>>) attributes {dimension_semantics = [#tpu.dimension_semantics<parallel>], iteration_bounds = array<i64: 2>, scalar_prefetch = 0 : i64, scratch_operands = 0 : i64, tpu.core_type = #tpu.core_type<tc>, window_params = [{pipeline_mode = #tpu.pipeline_mode<synchronous>, transform_indices = @transform_0, window_bounds = array<i64: 8, 8>}, {pipeline_mode = #tpu.pipeline_mode<synchronous>, transform_indices = @transform_1, window_bounds = array<i64: 1, 8, 1>}, {pipeline_mode = #tpu.pipeline_mode<synchronous>, transform_indices = @transform_2, window_bounds = array<i64: 1, 8, 1>}, {transform_indices = @transform_3, window_bounds = array<i64: 1, 8, 128>}, {transform_indices = @transform_4, window_bounds = array<i64: 1, 8, 128>}]} {
    %c0 = arith.constant 0 : index
    %c0_0 = arith.constant 0 : index
    %c0_1 = arith.constant 0 : index
    %0 = vector.load %arg4[%c0, %c0_0, %c0_1] : memref<1x8x128xf32, #tpu.memory_space<vmem>>, vector<1x8x128xf32>
    %1 = vector.shape_cast %0 : vector<1x8x128xf32> to vector<8x128xf32>
    %cst = arith.constant dense<0.000000e+00> : vector<128xf32>
    %2 = vector.multi_reduction <add>, %1, %cst [0] : vector<8x128xf32> to vector<128xf32>
    %3 = vector.shape_cast %2 : vector<128xf32> to vector<1x128xf32>
    %cst_2 = arith.constant 8.000000e+00 : f32
    %4 = vector.broadcast %cst_2 : f32 to vector<1x128xf32>
    %5 = arith.divf %3, %4 : vector<1x128xf32>
    %6 = arith.mulf %1, %1 : vector<8x128xf32>
    %cst_3 = arith.constant dense<0.000000e+00> : vector<128xf32>
    %7 = vector.multi_reduction <add>, %6, %cst_3 [0] : vector<8x128xf32> to vector<128xf32>
    %8 = vector.shape_cast %7 : vector<128xf32> to vector<1x128xf32>
    %cst_4 = arith.constant 8.000000e+00 : f32
    %9 = vector.broadcast %cst_4 : f32 to vector<1x128xf32>
    %10 = arith.divf %8, %9 : vector<1x128xf32>
    %11 = arith.mulf %5, %5 : vector<1x128xf32>
    %12 = arith.subf %10, %11 : vector<1x128xf32>
    %cst_5 = arith.constant 0.000000e+00 : f32
    %13 = vector.broadcast %cst_5 : f32 to vector<1x128xf32>
    %14 = arith.maximumf %12, %13 : vector<1x128xf32>
    %c0_6 = arith.constant 0 : index
    %c0_7 = arith.constant 0 : index
    %c0_8 = arith.constant 0 : index
    %15 = vector.load %arg2[%c0_6, %c0_7, %c0_8] : memref<1x8x1xf32, #tpu.memory_space<vmem>>, vector<1x8x1xf32>
    %16 = vector.shape_cast %15 : vector<1x8x1xf32> to vector<8x1xf32>
    %17 = vector.broadcast %5 : vector<1x128xf32> to vector<8x128xf32>
    %18 = arith.subf %1, %17 : vector<8x128xf32>
    %19 = vector.broadcast %16 : vector<8x1xf32> to vector<8x128xf32>
    %20 = arith.mulf %19, %18 : vector<8x128xf32>
    %cst_9 = arith.constant 1.1920929E-7 : f32
    %21 = vector.broadcast %cst_9 : f32 to vector<1x128xf32>
    %22 = arith.addf %14, %21 : vector<1x128xf32>
    %23 = math.rsqrt %22 : vector<1x128xf32>
    %24 = vector.broadcast %23 : vector<1x128xf32> to vector<8x128xf32>
    %25 = arith.mulf %20, %24 : vector<8x128xf32>
    %c0_10 = arith.constant 0 : index
    %c0_11 = arith.constant 0 : index
    %c0_12 = arith.constant 0 : index
    %26 = vector.load %arg3[%c0_10, %c0_11, %c0_12] : memref<1x8x1xf32, #tpu.memory_space<vmem>>, vector<1x8x1xf32>
    %27 = vector.shape_cast %26 : vector<1x8x1xf32> to vector<8x1xf32>
    %28 = vector.broadcast %27 : vector<8x1xf32> to vector<8x128xf32>
    %29 = arith.addf %25, %28 : vector<8x128xf32>
    %30 = tpu.iota {dimensions = array<i32: 1>} : vector<1x128xi32>
    %c16_i32 = arith.constant 16 : i32
    %31 = vector.broadcast %c16_i32 : i32 to vector<1x128xi32>
    %32 = arith.cmpi slt, %30, %31 : vector<1x128xi32>
    %33 = arith.extui %32 : vector<1x128xi1> to vector<1x128xi32>
    %34 = arith.sitofp %33 : vector<1x128xi32> to vector<1x128xf32>
    %35 = vector.broadcast %34 : vector<1x128xf32> to vector<8x128xf32>
    %36 = arith.mulf %29, %35 : vector<8x128xf32>
    %c0_13 = arith.constant 0 : index
    %c0_14 = arith.constant 0 : index
    %37 = vector.load %arg1[%c0_13, %c0_14] : memref<8x8xbf16, #tpu.memory_space<vmem>>, vector<8x8xbf16>
    %38 = arith.truncf %36 : vector<8x128xf32> to vector<8x128xbf16>
    %cst_15 = arith.constant dense<0.000000e+00> : vector<8x128xf32>
    %39 = tpu.matmul %37, %38, %cst_15 {dimension_numbers = #tpu.dot_dimension_numbers<[1], [0], [0], [1], [0, 0, 1, 1], [], []>} : vector<8x8xbf16>, vector<8x128xbf16>, vector<8x128xf32> -> vector<8x128xf32>
    %c0_16 = arith.constant 0 : index
    %c0_17 = arith.constant 0 : index
    %c0_18 = arith.constant 0 : index
    %40 = vector.load %arg5[%c0_16, %c0_17, %c0_18] : memref<1x8x128xf32, #tpu.memory_space<vmem>>, vector<1x8x128xf32>
    %41 = vector.shape_cast %40 : vector<1x8x128xf32> to vector<8x128xf32>
    %42 = vector.shape_cast %39 : vector<8x128xf32> to vector<1x8x128xf32>
    tpu.vector_store %arg5[%c0_16, %c0_17, %c0_18], %42 {strides = array<i32>} : memref<1x8x128xf32, #tpu.memory_space<vmem>>, vector<1x8x128xf32>,
    return
  }
  func.func @transform_0(%arg0: i32) -> (i32, i32) {
    %c0_i32 = arith.constant 0 : i32
    %c0_i32_0 = arith.constant 0 : i32
    %c0_i32_1 = arith.constant 0 : i32
    return %c0_i32, %c0_i32_0 : i32, i32
  }
  func.func @transform_1(%arg0: i32) -> (i32, i32, i32) {
    %c0_i32 = arith.constant 0 : i32
    %c0_i32_0 = arith.constant 0 : i32
    %c0_i32_1 = arith.constant 0 : i32
    %c0_i32_2 = arith.constant 0 : i32
    return %c0_i32, %c0_i32_0, %c0_i32_1 : i32, i32, i32
  }
  func.func @transform_2(%arg0: i32) -> (i32, i32, i32) {
    %c0_i32 = arith.constant 0 : i32
    %c0_i32_0 = arith.constant 0 : i32
    %c0_i32_1 = arith.constant 0 : i32
    %c0_i32_2 = arith.constant 0 : i32
    return %c0_i32, %c0_i32_0, %c0_i32_1 : i32, i32, i32
  }
  func.func @transform_3(%arg0: i32) -> (i32, i32, i32) {
    %c0_i32 = arith.constant 0 : i32
    %c0_i32_0 = arith.constant 0 : i32
    %c0_i32_1 = arith.constant 0 : i32
    return %arg0, %c0_i32, %c0_i32_0 : i32, i32, i32
  }
  func.func @transform_4(%arg0: i32) -> (i32, i32, i32) {
    %c0_i32 = arith.constant 0 : i32
    %c0_i32_0 = arith.constant 0 : i32
    %c0_i32_1 = arith.constant 0 : i32
    return %arg0, %c0_i32, %c0_i32_0 : i32, i32, i32
  }
}

module attributes {stable_mosaic.version = 11 : i64} {
  func.func @_mask_conv_relu_kernel(%arg0: i32, %arg1: memref<16x8xbf16, #tpu.memory_space<vmem>>, %arg2: memref<1x8x128xf32, #tpu.memory_space<vmem>>, %arg3: memref<1x16x128xf32, #tpu.memory_space<vmem>>) attributes {dimension_semantics = [#tpu.dimension_semantics<parallel>], iteration_bounds = array<i64: 2>, scalar_prefetch = 0 : i64, scratch_operands = 0 : i64, tpu.core_type = #tpu.core_type<tc>, window_params = [{pipeline_mode = #tpu.pipeline_mode<synchronous>, transform_indices = @transform_0, window_bounds = array<i64: 16, 8>}, {transform_indices = @transform_1, window_bounds = array<i64: 1, 8, 128>}, {transform_indices = @transform_2, window_bounds = array<i64: 1, 16, 128>}]} {
    %c0 = arith.constant 0 : index
    %c0_0 = arith.constant 0 : index
    %0 = vector.load %arg1[%c0, %c0_0] : memref<16x8xbf16, #tpu.memory_space<vmem>>, vector<16x8xbf16>
    %c0_1 = arith.constant 0 : index
    %c0_2 = arith.constant 0 : index
    %c0_3 = arith.constant 0 : index
    %1 = vector.load %arg2[%c0_1, %c0_2, %c0_3] : memref<1x8x128xf32, #tpu.memory_space<vmem>>, vector<1x8x128xf32>
    %2 = vector.shape_cast %1 : vector<1x8x128xf32> to vector<8x128xf32>
    %3 = arith.truncf %2 : vector<8x128xf32> to vector<8x128xbf16>
    %cst = arith.constant dense<0.000000e+00> : vector<16x128xf32>
    %4 = tpu.matmul %0, %3, %cst {dimension_numbers = #tpu.dot_dimension_numbers<[1], [0], [0], [1], [0, 0, 1, 1], [], []>} : vector<16x8xbf16>, vector<8x128xbf16>, vector<16x128xf32> -> vector<16x128xf32>
    %cst_4 = arith.constant 0.000000e+00 : f32
    %5 = vector.broadcast %cst_4 : f32 to vector<16x128xf32>
    %6 = arith.maximumf %4, %5 : vector<16x128xf32>
    %c0_5 = arith.constant 0 : index
    %c0_6 = arith.constant 0 : index
    %c0_7 = arith.constant 0 : index
    %7 = vector.load %arg3[%c0_5, %c0_6, %c0_7] : memref<1x16x128xf32, #tpu.memory_space<vmem>>, vector<1x16x128xf32>
    %8 = vector.shape_cast %7 : vector<1x16x128xf32> to vector<16x128xf32>
    %9 = vector.shape_cast %6 : vector<16x128xf32> to vector<1x16x128xf32>
    tpu.vector_store %arg3[%c0_5, %c0_6, %c0_7], %9 {strides = array<i32>} : memref<1x16x128xf32, #tpu.memory_space<vmem>>, vector<1x16x128xf32>,
    return
  }
  func.func @transform_0(%arg0: i32) -> (i32, i32) {
    %c0_i32 = arith.constant 0 : i32
    %c0_i32_0 = arith.constant 0 : i32
    %c0_i32_1 = arith.constant 0 : i32
    return %c0_i32, %c0_i32_0 : i32, i32
  }
  func.func @transform_1(%arg0: i32) -> (i32, i32, i32) {
    %c0_i32 = arith.constant 0 : i32
    %c0_i32_0 = arith.constant 0 : i32
    %c0_i32_1 = arith.constant 0 : i32
    return %arg0, %c0_i32, %c0_i32_0 : i32, i32, i32
  }
  func.func @transform_2(%arg0: i32) -> (i32, i32, i32) {
    %c0_i32 = arith.constant 0 : i32
    %c0_i32_0 = arith.constant 0 : i32
    %c0_i32_1 = arith.constant 0 : i32
    return %arg0, %c0_i32, %c0_i32_0 : i32, i32, i32
  }
}

module attributes {stable_mosaic.version = 11 : i64} {
  func.func @kernel(%arg0: i32, %arg1: memref<2x2xf32, #tpu.memory_space<smem>>, %arg2: memref<2x8x8xbf16, #tpu.memory_space<vmem>>, %arg3: memref<2x8x1xf32, #tpu.memory_space<vmem>>, %arg4: memref<2x8x1xf32, #tpu.memory_space<vmem>>, %arg5: memref<2x8x3xf32, #tpu.memory_space<vmem>>, %arg6: memref<2x8x1xf32, #tpu.memory_space<vmem>>, %arg7: memref<2x8x1xf32, #tpu.memory_space<vmem>>, %arg8: memref<2x8x8xbf16, #tpu.memory_space<vmem>>, %arg9: memref<1x8x128xf32, #tpu.memory_space<vmem>>, %arg10: memref<1x8x128xf32, #tpu.memory_space<vmem>>) attributes {dimension_semantics = [#tpu.dimension_semantics<parallel>], iteration_bounds = array<i64: 2>, scalar_prefetch = 0 : i64, scratch_operands = 0 : i64, tpu.core_type = #tpu.core_type<tc>, window_params = [{transform_indices = @transform_0, window_bounds = array<i64: 2, 2>}, {pipeline_mode = #tpu.pipeline_mode<synchronous>, transform_indices = @transform_1, window_bounds = array<i64: 2, 8, 8>}, {pipeline_mode = #tpu.pipeline_mode<synchronous>, transform_indices = @transform_2, window_bounds = array<i64: 2, 8, 1>}, {pipeline_mode = #tpu.pipeline_mode<synchronous>, transform_indices = @transform_3, window_bounds = array<i64: 2, 8, 1>}, {pipeline_mode = #tpu.pipeline_mode<synchronous>, transform_indices = @transform_4, window_bounds = array<i64: 2, 8, 3>}, {pipeline_mode = #tpu.pipeline_mode<synchronous>, transform_indices = @transform_5, window_bounds = array<i64: 2, 8, 1>}, {pipeline_mode = #tpu.pipeline_mode<synchronous>, transform_indices = @transform_6, window_bounds = array<i64: 2, 8, 1>}, {pipeline_mode = #tpu.pipeline_mode<synchronous>, transform_indices = @transform_7, window_bounds = array<i64: 2, 8, 8>}, {transform_indices = @transform_8, window_bounds = array<i64: 1, 8, 128>}, {transform_indices = @transform_9, window_bounds = array<i64: 1, 8, 128>}]} {
    %c0 = arith.constant 0 : index
    %c0_0 = arith.constant 0 : index
    %c0_1 = arith.constant 0 : index
    %0 = vector.load %arg9[%c0, %c0_0, %c0_1] : memref<1x8x128xf32, #tpu.memory_space<vmem>>, vector<1x8x128xf32>
    %1 = vector.shape_cast %0 : vector<1x8x128xf32> to vector<8x128xf32>
    %2 = tpu.iota {dimensions = array<i32: 1>} : vector<1x128xi32>
    %c16_i32 = arith.constant 16 : i32
    %3 = vector.broadcast %c16_i32 : i32 to vector<1x128xi32>
    %4 = arith.cmpi slt, %2, %3 : vector<1x128xi32>
    %5 = arith.extui %4 : vector<1x128xi1> to vector<1x128xi32>
    %6 = arith.sitofp %5 : vector<1x128xi32> to vector<1x128xf32>
    %c0_2 = arith.constant 0 : index
    %c0_3 = arith.constant 0 : index
    %7 = memref.load %arg1[%c0_2, %c0_3] : memref<2x2xf32, #tpu.memory_space<smem>>
    %c0_4 = arith.constant 0 : index
    %c1 = arith.constant 1 : index
    %8 = memref.load %arg1[%c0_4, %c1] : memref<2x2xf32, #tpu.memory_space<smem>>
    %c0_5 = arith.constant 0 : index
    %c0_6 = arith.constant 0 : index
    %c0_7 = arith.constant 0 : index
    %9 = vector.load %arg2[%c0_5, %c0_6, %c0_7] : memref<2x8x8xbf16, #tpu.memory_space<vmem>>, vector<1x8x8xbf16>
    %10 = vector.shape_cast %9 : vector<1x8x8xbf16> to vector<8x8xbf16>
    %11 = arith.truncf %1 : vector<8x128xf32> to vector<8x128xbf16>
    %cst = arith.constant dense<0.000000e+00> : vector<8x128xf32>
    %12 = tpu.matmul %10, %11, %cst {dimension_numbers = #tpu.dot_dimension_numbers<[1], [0], [0], [1], [0, 0, 1, 1], [], []>} : vector<8x8xbf16>, vector<8x128xbf16>, vector<8x128xf32> -> vector<8x128xf32>
    %cst_8 = arith.constant 0.000000e+00 : f32
    %13 = vector.broadcast %cst_8 : f32 to vector<8x128xf32>
    %14 = arith.cmpf oge, %12, %13 : vector<8x128xf32>
    %15 = vector.broadcast %7 : f32 to vector<8x128xf32>
    %16 = arith.mulf %15, %12 : vector<8x128xf32>
    %17 = arith.select %14, %12, %16 : vector<8x128xi1>, vector<8x128xf32>
    %18 = vector.shape_cast %17 : vector<8x128xf32> to vector<1x8x128xf32>
    %cst_9 = arith.constant dense<0.000000e+00> : vector<1xf32>
    %19 = vector.multi_reduction <add>, %18, %cst_9 [1, 2] : vector<1x8x128xf32> to vector<1xf32>
    %20 = vector.shape_cast %19 : vector<1xf32> to vector<1x1x1xf32>
    %21 = vector.extract %20[0, 0, 0] : f32 from vector<1x1x1xf32>
    %cst_10 = arith.constant 7.812500e-03 : f32
    %22 = arith.mulf %21, %cst_10 : f32
    %23 = arith.mulf %17, %17 : vector<8x128xf32>
    %24 = vector.shape_cast %23 : vector<8x128xf32> to vector<1x8x128xf32>
    %cst_11 = arith.constant dense<0.000000e+00> : vector<1xf32>
    %25 = vector.multi_reduction <add>, %24, %cst_11 [1, 2] : vector<1x8x128xf32> to vector<1xf32>
    %26 = vector.shape_cast %25 : vector<1xf32> to vector<1x1x1xf32>
    %27 = vector.extract %26[0, 0, 0] : f32 from vector<1x1x1xf32>
    %cst_12 = arith.constant 7.812500e-03 : f32
    %28 = arith.mulf %27, %cst_12 : f32
    %29 = arith.mulf %22, %22 : f32
    %30 = arith.subf %28, %29 : f32
    %cst_13 = arith.constant 0.000000e+00 : f32
    %31 = arith.maximumf %30, %cst_13 : f32
    %c0_14 = arith.constant 0 : index
    %c0_15 = arith.constant 0 : index
    %c0_16 = arith.constant 0 : index
    %32 = vector.load %arg3[%c0_14, %c0_15, %c0_16] : memref<2x8x1xf32, #tpu.memory_space<vmem>>, vector<1x8x1xf32>
    %33 = vector.shape_cast %32 : vector<1x8x1xf32> to vector<8x1xf32>
    %cst_17 = arith.constant 1.1920929E-7 : f32
    %34 = arith.addf %31, %cst_17 : f32
    %35 = math.rsqrt %34 : f32
    %36 = vector.broadcast %35 : f32 to vector<8x1xf32>
    %37 = arith.mulf %33, %36 : vector<8x1xf32>
    %c0_18 = arith.constant 0 : index
    %c0_19 = arith.constant 0 : index
    %c0_20 = arith.constant 0 : index
    %38 = vector.load %arg4[%c0_18, %c0_19, %c0_20] : memref<2x8x1xf32, #tpu.memory_space<vmem>>, vector<1x8x1xf32>
    %39 = vector.shape_cast %38 : vector<1x8x1xf32> to vector<8x1xf32>
    %40 = vector.broadcast %22 : f32 to vector<8x1xf32>
    %41 = arith.mulf %40, %37 : vector<8x1xf32>
    %42 = arith.subf %39, %41 : vector<8x1xf32>
    %43 = vector.broadcast %37 : vector<8x1xf32> to vector<8x128xf32>
    %44 = arith.mulf %43, %17 : vector<8x128xf32>
    %45 = vector.broadcast %42 : vector<8x1xf32> to vector<8x128xf32>
    %46 = arith.addf %44, %45 : vector<8x128xf32>
    %47 = vector.broadcast %6 : vector<1x128xf32> to vector<8x128xf32>
    %48 = arith.mulf %46, %47 : vector<8x128xf32>
    %c0_21 = arith.constant 0 : index
    %c0_22 = arith.constant 0 : index
    %c0_23 = arith.constant 0 : index
    %49 = vector.load %arg5[%c0_21, %c0_22, %c0_23] : memref<2x8x3xf32, #tpu.memory_space<vmem>>, vector<1x8x3xf32>
    %50 = vector.shape_cast %49 : vector<1x8x3xf32> to vector<8x3xf32>
    %c1_i32 = arith.constant 1 : i32
    %51 = tpu.dynamic_rotate %48 by %c1_i32 dim 1 : vector<8x128xf32>, i32 -> vector<8x128xf32>
    %c1_i32_24 = arith.constant 1 : i32
    %52 = vector.broadcast %c1_i32_24 : i32 to vector<1x128xi32>
    %53 = arith.cmpi sge, %2, %52 : vector<1x128xi32>
    %54 = arith.extui %53 : vector<1x128xi1> to vector<1x128xi32>
    %55 = arith.sitofp %54 : vector<1x128xi32> to vector<1x128xf32>
    %56 = vector.extract_strided_slice %50 {offsets = [0, 0], sizes = [8, 1], strides = [1, 1]} : vector<8x3xf32> to vector<8x1xf32>
    %57 = vector.broadcast %55 : vector<1x128xf32> to vector<8x128xf32>
    %58 = arith.mulf %51, %57 : vector<8x128xf32>
    %59 = vector.broadcast %56 : vector<8x1xf32> to vector<8x128xf32>
    %60 = arith.mulf %59, %58 : vector<8x128xf32>
    %61 = vector.extract_strided_slice %50 {offsets = [0, 1], sizes = [8, 1], strides = [1, 1]} : vector<8x3xf32> to vector<8x1xf32>
    %62 = vector.broadcast %61 : vector<8x1xf32> to vector<8x128xf32>
    %63 = arith.mulf %62, %48 : vector<8x128xf32>
    %64 = arith.addf %60, %63 : vector<8x128xf32>
    %c127_i32 = arith.constant 127 : i32
    %65 = tpu.dynamic_rotate %48 by %c127_i32 dim 1 : vector<8x128xf32>, i32 -> vector<8x128xf32>
    %c127_i32_25 = arith.constant 127 : i32
    %66 = vector.broadcast %c127_i32_25 : i32 to vector<1x128xi32>
    %67 = arith.cmpi slt, %2, %66 : vector<1x128xi32>
    %68 = arith.extui %67 : vector<1x128xi1> to vector<1x128xi32>
    %69 = arith.sitofp %68 : vector<1x128xi32> to vector<1x128xf32>
    %70 = vector.extract_strided_slice %50 {offsets = [0, 2], sizes = [8, 1], strides = [1, 1]} : vector<8x3xf32> to vector<8x1xf32>
    %71 = vector.broadcast %69 : vector<1x128xf32> to vector<8x128xf32>
    %72 = arith.mulf %65, %71 : vector<8x128xf32>
    %73 = vector.broadcast %70 : vector<8x1xf32> to vector<8x128xf32>
    %74 = arith.mulf %73, %72 : vector<8x128xf32>
    %75 = arith.addf %64, %74 : vector<8x128xf32>
    %cst_26 = arith.constant 0.000000e+00 : f32
    %76 = vector.broadcast %cst_26 : f32 to vector<8x128xf32>
    %77 = arith.cmpf oge, %75, %76 : vector<8x128xf32>
    %78 = vector.broadcast %8 : f32 to vector<8x128xf32>
    %79 = arith.mulf %78, %75 : vector<8x128xf32>
    %80 = arith.select %77, %75, %79 : vector<8x128xi1>, vector<8x128xf32>
    %81 = vector.broadcast %6 : vector<1x128xf32> to vector<8x128xf32>
    %82 = arith.mulf %80, %81 : vector<8x128xf32>
    %83 = vector.shape_cast %82 : vector<8x128xf32> to vector<1x8x128xf32>
    %cst_27 = arith.constant dense<0.000000e+00> : vector<1xf32>
    %84 = vector.multi_reduction <add>, %83, %cst_27 [1, 2] : vector<1x8x128xf32> to vector<1xf32>
    %85 = vector.shape_cast %84 : vector<1xf32> to vector<1x1x1xf32>
    %86 = vector.extract %85[0, 0, 0] : f32 from vector<1x1x1xf32>
    %cst_28 = arith.constant 7.812500e-03 : f32
    %87 = arith.mulf %86, %cst_28 : f32
    %88 = arith.mulf %82, %82 : vector<8x128xf32>
    %89 = vector.shape_cast %88 : vector<8x128xf32> to vector<1x8x128xf32>
    %cst_29 = arith.constant dense<0.000000e+00> : vector<1xf32>
    %90 = vector.multi_reduction <add>, %89, %cst_29 [1, 2] : vector<1x8x128xf32> to vector<1xf32>
    %91 = vector.shape_cast %90 : vector<1xf32> to vector<1x1x1xf32>
    %92 = vector.extract %91[0, 0, 0] : f32 from vector<1x1x1xf32>
    %cst_30 = arith.constant 7.812500e-03 : f32
    %93 = arith.mulf %92, %cst_30 : f32
    %94 = arith.mulf %87, %87 : f32
    %95 = arith.subf %93, %94 : f32
    %cst_31 = arith.constant 0.000000e+00 : f32
    %96 = arith.maximumf %95, %cst_31 : f32
    %c0_32 = arith.constant 0 : index
    %c0_33 = arith.constant 0 : index
    %c0_34 = arith.constant 0 : index
    %97 = vector.load %arg6[%c0_32, %c0_33, %c0_34] : memref<2x8x1xf32, #tpu.memory_space<vmem>>, vector<1x8x1xf32>
    %98 = vector.shape_cast %97 : vector<1x8x1xf32> to vector<8x1xf32>
    %cst_35 = arith.constant 1.1920929E-7 : f32
    %99 = arith.addf %96, %cst_35 : f32
    %100 = math.rsqrt %99 : f32
    %101 = vector.broadcast %100 : f32 to vector<8x1xf32>
    %102 = arith.mulf %98, %101 : vector<8x1xf32>
    %c0_36 = arith.constant 0 : index
    %c0_37 = arith.constant 0 : index
    %c0_38 = arith.constant 0 : index
    %103 = vector.load %arg7[%c0_36, %c0_37, %c0_38] : memref<2x8x1xf32, #tpu.memory_space<vmem>>, vector<1x8x1xf32>
    %104 = vector.shape_cast %103 : vector<1x8x1xf32> to vector<8x1xf32>
    %105 = vector.broadcast %87 : f32 to vector<8x1xf32>
    %106 = arith.mulf %105, %102 : vector<8x1xf32>
    %107 = arith.subf %104, %106 : vector<8x1xf32>
    %108 = vector.broadcast %102 : vector<8x1xf32> to vector<8x128xf32>
    %109 = arith.mulf %108, %80 : vector<8x128xf32>
    %110 = vector.broadcast %107 : vector<8x1xf32> to vector<8x128xf32>
    %111 = arith.addf %109, %110 : vector<8x128xf32>
    %112 = vector.broadcast %6 : vector<1x128xf32> to vector<8x128xf32>
    %113 = arith.mulf %111, %112 : vector<8x128xf32>
    %c0_39 = arith.constant 0 : index
    %c0_40 = arith.constant 0 : index
    %c0_41 = arith.constant 0 : index
    %114 = vector.load %arg8[%c0_39, %c0_40, %c0_41] : memref<2x8x8xbf16, #tpu.memory_space<vmem>>, vector<1x8x8xbf16>
    %115 = vector.shape_cast %114 : vector<1x8x8xbf16> to vector<8x8xbf16>
    %116 = arith.truncf %113 : vector<8x128xf32> to vector<8x128xbf16>
    %cst_42 = arith.constant dense<0.000000e+00> : vector<8x128xf32>
    %117 = tpu.matmul %115, %116, %cst_42 {dimension_numbers = #tpu.dot_dimension_numbers<[1], [0], [0], [1], [0, 0, 1, 1], [], []>} : vector<8x8xbf16>, vector<8x128xbf16>, vector<8x128xf32> -> vector<8x128xf32>
    %118 = arith.addf %117, %1 : vector<8x128xf32>
    %c1_43 = arith.constant 1 : index
    %c0_44 = arith.constant 0 : index
    %119 = memref.load %arg1[%c1_43, %c0_44] : memref<2x2xf32, #tpu.memory_space<smem>>
    %c1_45 = arith.constant 1 : index
    %c1_46 = arith.constant 1 : index
    %120 = memref.load %arg1[%c1_45, %c1_46] : memref<2x2xf32, #tpu.memory_space<smem>>
    %c1_47 = arith.constant 1 : index
    %c0_48 = arith.constant 0 : index
    %c0_49 = arith.constant 0 : index
    %121 = vector.load %arg2[%c1_47, %c0_48, %c0_49] : memref<2x8x8xbf16, #tpu.memory_space<vmem>>, vector<1x8x8xbf16>
    %122 = vector.shape_cast %121 : vector<1x8x8xbf16> to vector<8x8xbf16>
    %123 = arith.truncf %118 : vector<8x128xf32> to vector<8x128xbf16>
    %cst_50 = arith.constant dense<0.000000e+00> : vector<8x128xf32>
    %124 = tpu.matmul %122, %123, %cst_50 {dimension_numbers = #tpu.dot_dimension_numbers<[1], [0], [0], [1], [0, 0, 1, 1], [], []>} : vector<8x8xbf16>, vector<8x128xbf16>, vector<8x128xf32> -> vector<8x128xf32>
    %cst_51 = arith.constant 0.000000e+00 : f32
    %125 = vector.broadcast %cst_51 : f32 to vector<8x128xf32>
    %126 = arith.cmpf oge, %124, %125 : vector<8x128xf32>
    %127 = vector.broadcast %119 : f32 to vector<8x128xf32>
    %128 = arith.mulf %127, %124 : vector<8x128xf32>
    %129 = arith.select %126, %124, %128 : vector<8x128xi1>, vector<8x128xf32>
    %130 = vector.shape_cast %129 : vector<8x128xf32> to vector<1x8x128xf32>
    %cst_52 = arith.constant dense<0.000000e+00> : vector<1xf32>
    %131 = vector.multi_reduction <add>, %130, %cst_52 [1, 2] : vector<1x8x128xf32> to vector<1xf32>
    %132 = vector.shape_cast %131 : vector<1xf32> to vector<1x1x1xf32>
    %133 = vector.extract %132[0, 0, 0] : f32 from vector<1x1x1xf32>
    %cst_53 = arith.constant 7.812500e-03 : f32
    %134 = arith.mulf %133, %cst_53 : f32
    %135 = arith.mulf %129, %129 : vector<8x128xf32>
    %136 = vector.shape_cast %135 : vector<8x128xf32> to vector<1x8x128xf32>
    %cst_54 = arith.constant dense<0.000000e+00> : vector<1xf32>
    %137 = vector.multi_reduction <add>, %136, %cst_54 [1, 2] : vector<1x8x128xf32> to vector<1xf32>
    %138 = vector.shape_cast %137 : vector<1xf32> to vector<1x1x1xf32>
    %139 = vector.extract %138[0, 0, 0] : f32 from vector<1x1x1xf32>
    %cst_55 = arith.constant 7.812500e-03 : f32
    %140 = arith.mulf %139, %cst_55 : f32
    %141 = arith.mulf %134, %134 : f32
    %142 = arith.subf %140, %141 : f32
    %cst_56 = arith.constant 0.000000e+00 : f32
    %143 = arith.maximumf %142, %cst_56 : f32
    %c1_57 = arith.constant 1 : index
    %c0_58 = arith.constant 0 : index
    %c0_59 = arith.constant 0 : index
    %144 = vector.load %arg3[%c1_57, %c0_58, %c0_59] : memref<2x8x1xf32, #tpu.memory_space<vmem>>, vector<1x8x1xf32>
    %145 = vector.shape_cast %144 : vector<1x8x1xf32> to vector<8x1xf32>
    %cst_60 = arith.constant 1.1920929E-7 : f32
    %146 = arith.addf %143, %cst_60 : f32
    %147 = math.rsqrt %146 : f32
    %148 = vector.broadcast %147 : f32 to vector<8x1xf32>
    %149 = arith.mulf %145, %148 : vector<8x1xf32>
    %c1_61 = arith.constant 1 : index
    %c0_62 = arith.constant 0 : index
    %c0_63 = arith.constant 0 : index
    %150 = vector.load %arg4[%c1_61, %c0_62, %c0_63] : memref<2x8x1xf32, #tpu.memory_space<vmem>>, vector<1x8x1xf32>
    %151 = vector.shape_cast %150 : vector<1x8x1xf32> to vector<8x1xf32>
    %152 = vector.broadcast %134 : f32 to vector<8x1xf32>
    %153 = arith.mulf %152, %149 : vector<8x1xf32>
    %154 = arith.subf %151, %153 : vector<8x1xf32>
    %155 = vector.broadcast %149 : vector<8x1xf32> to vector<8x128xf32>
    %156 = arith.mulf %155, %129 : vector<8x128xf32>
    %157 = vector.broadcast %154 : vector<8x1xf32> to vector<8x128xf32>
    %158 = arith.addf %156, %157 : vector<8x128xf32>
    %159 = vector.broadcast %6 : vector<1x128xf32> to vector<8x128xf32>
    %160 = arith.mulf %158, %159 : vector<8x128xf32>
    %c1_64 = arith.constant 1 : index
    %c0_65 = arith.constant 0 : index
    %c0_66 = arith.constant 0 : index
    %161 = vector.load %arg5[%c1_64, %c0_65, %c0_66] : memref<2x8x3xf32, #tpu.memory_space<vmem>>, vector<1x8x3xf32>
    %162 = vector.shape_cast %161 : vector<1x8x3xf32> to vector<8x3xf32>
    %c2_i32 = arith.constant 2 : i32
    %163 = tpu.dynamic_rotate %160 by %c2_i32 dim 1 : vector<8x128xf32>, i32 -> vector<8x128xf32>
    %c2_i32_67 = arith.constant 2 : i32
    %164 = vector.broadcast %c2_i32_67 : i32 to vector<1x128xi32>
    %165 = arith.cmpi sge, %2, %164 : vector<1x128xi32>
    %166 = arith.extui %165 : vector<1x128xi1> to vector<1x128xi32>
    %167 = arith.sitofp %166 : vector<1x128xi32> to vector<1x128xf32>
    %168 = vector.extract_strided_slice %162 {offsets = [0, 0], sizes = [8, 1], strides = [1, 1]} : vector<8x3xf32> to vector<8x1xf32>
    %169 = vector.broadcast %167 : vector<1x128xf32> to vector<8x128xf32>
    %170 = arith.mulf %163, %169 : vector<8x128xf32>
    %171 = vector.broadcast %168 : vector<8x1xf32> to vector<8x128xf32>
    %172 = arith.mulf %171, %170 : vector<8x128xf32>
    %173 = vector.extract_strided_slice %162 {offsets = [0, 1], sizes = [8, 1], strides = [1, 1]} : vector<8x3xf32> to vector<8x1xf32>
    %174 = vector.broadcast %173 : vector<8x1xf32> to vector<8x128xf32>
    %175 = arith.mulf %174, %160 : vector<8x128xf32>
    %176 = arith.addf %172, %175 : vector<8x128xf32>
    %c126_i32 = arith.constant 126 : i32
    %177 = tpu.dynamic_rotate %160 by %c126_i32 dim 1 : vector<8x128xf32>, i32 -> vector<8x128xf32>
    %c126_i32_68 = arith.constant 126 : i32
    %178 = vector.broadcast %c126_i32_68 : i32 to vector<1x128xi32>
    %179 = arith.cmpi slt, %2, %178 : vector<1x128xi32>
    %180 = arith.extui %179 : vector<1x128xi1> to vector<1x128xi32>
    %181 = arith.sitofp %180 : vector<1x128xi32> to vector<1x128xf32>
    %182 = vector.extract_strided_slice %162 {offsets = [0, 2], sizes = [8, 1], strides = [1, 1]} : vector<8x3xf32> to vector<8x1xf32>
    %183 = vector.broadcast %181 : vector<1x128xf32> to vector<8x128xf32>
    %184 = arith.mulf %177, %183 : vector<8x128xf32>
    %185 = vector.broadcast %182 : vector<8x1xf32> to vector<8x128xf32>
    %186 = arith.mulf %185, %184 : vector<8x128xf32>
    %187 = arith.addf %176, %186 : vector<8x128xf32>
    %cst_69 = arith.constant 0.000000e+00 : f32
    %188 = vector.broadcast %cst_69 : f32 to vector<8x128xf32>
    %189 = arith.cmpf oge, %187, %188 : vector<8x128xf32>
    %190 = vector.broadcast %120 : f32 to vector<8x128xf32>
    %191 = arith.mulf %190, %187 : vector<8x128xf32>
    %192 = arith.select %189, %187, %191 : vector<8x128xi1>, vector<8x128xf32>
    %193 = vector.broadcast %6 : vector<1x128xf32> to vector<8x128xf32>
    %194 = arith.mulf %192, %193 : vector<8x128xf32>
    %195 = vector.shape_cast %194 : vector<8x128xf32> to vector<1x8x128xf32>
    %cst_70 = arith.constant dense<0.000000e+00> : vector<1xf32>
    %196 = vector.multi_reduction <add>, %195, %cst_70 [1, 2] : vector<1x8x128xf32> to vector<1xf32>
    %197 = vector.shape_cast %196 : vector<1xf32> to vector<1x1x1xf32>
    %198 = vector.extract %197[0, 0, 0] : f32 from vector<1x1x1xf32>
    %cst_71 = arith.constant 7.812500e-03 : f32
    %199 = arith.mulf %198, %cst_71 : f32
    %200 = arith.mulf %194, %194 : vector<8x128xf32>
    %201 = vector.shape_cast %200 : vector<8x128xf32> to vector<1x8x128xf32>
    %cst_72 = arith.constant dense<0.000000e+00> : vector<1xf32>
    %202 = vector.multi_reduction <add>, %201, %cst_72 [1, 2] : vector<1x8x128xf32> to vector<1xf32>
    %203 = vector.shape_cast %202 : vector<1xf32> to vector<1x1x1xf32>
    %204 = vector.extract %203[0, 0, 0] : f32 from vector<1x1x1xf32>
    %cst_73 = arith.constant 7.812500e-03 : f32
    %205 = arith.mulf %204, %cst_73 : f32
    %206 = arith.mulf %199, %199 : f32
    %207 = arith.subf %205, %206 : f32
    %cst_74 = arith.constant 0.000000e+00 : f32
    %208 = arith.maximumf %207, %cst_74 : f32
    %c1_75 = arith.constant 1 : index
    %c0_76 = arith.constant 0 : index
    %c0_77 = arith.constant 0 : index
    %209 = vector.load %arg6[%c1_75, %c0_76, %c0_77] : memref<2x8x1xf32, #tpu.memory_space<vmem>>, vector<1x8x1xf32>
    %210 = vector.shape_cast %209 : vector<1x8x1xf32> to vector<8x1xf32>
    %cst_78 = arith.constant 1.1920929E-7 : f32
    %211 = arith.addf %208, %cst_78 : f32
    %212 = math.rsqrt %211 : f32
    %213 = vector.broadcast %212 : f32 to vector<8x1xf32>
    %214 = arith.mulf %210, %213 : vector<8x1xf32>
    %c1_79 = arith.constant 1 : index
    %c0_80 = arith.constant 0 : index
    %c0_81 = arith.constant 0 : index
    %215 = vector.load %arg7[%c1_79, %c0_80, %c0_81] : memref<2x8x1xf32, #tpu.memory_space<vmem>>, vector<1x8x1xf32>
    %216 = vector.shape_cast %215 : vector<1x8x1xf32> to vector<8x1xf32>
    %217 = vector.broadcast %199 : f32 to vector<8x1xf32>
    %218 = arith.mulf %217, %214 : vector<8x1xf32>
    %219 = arith.subf %216, %218 : vector<8x1xf32>
    %220 = vector.broadcast %214 : vector<8x1xf32> to vector<8x128xf32>
    %221 = arith.mulf %220, %192 : vector<8x128xf32>
    %222 = vector.broadcast %219 : vector<8x1xf32> to vector<8x128xf32>
    %223 = arith.addf %221, %222 : vector<8x128xf32>
    %224 = vector.broadcast %6 : vector<1x128xf32> to vector<8x128xf32>
    %225 = arith.mulf %223, %224 : vector<8x128xf32>
    %c1_82 = arith.constant 1 : index
    %c0_83 = arith.constant 0 : index
    %c0_84 = arith.constant 0 : index
    %226 = vector.load %arg8[%c1_82, %c0_83, %c0_84] : memref<2x8x8xbf16, #tpu.memory_space<vmem>>, vector<1x8x8xbf16>
    %227 = vector.shape_cast %226 : vector<1x8x8xbf16> to vector<8x8xbf16>
    %228 = arith.truncf %225 : vector<8x128xf32> to vector<8x128xbf16>
    %cst_85 = arith.constant dense<0.000000e+00> : vector<8x128xf32>
    %229 = tpu.matmul %227, %228, %cst_85 {dimension_numbers = #tpu.dot_dimension_numbers<[1], [0], [0], [1], [0, 0, 1, 1], [], []>} : vector<8x8xbf16>, vector<8x128xbf16>, vector<8x128xf32> -> vector<8x128xf32>
    %230 = arith.addf %229, %118 : vector<8x128xf32>
    %c0_86 = arith.constant 0 : index
    %c0_87 = arith.constant 0 : index
    %c0_88 = arith.constant 0 : index
    %231 = vector.load %arg10[%c0_86, %c0_87, %c0_88] : memref<1x8x128xf32, #tpu.memory_space<vmem>>, vector<1x8x128xf32>
    %232 = vector.shape_cast %231 : vector<1x8x128xf32> to vector<8x128xf32>
    %233 = vector.shape_cast %230 : vector<8x128xf32> to vector<1x8x128xf32>
    tpu.vector_store %arg10[%c0_86, %c0_87, %c0_88], %233 {strides = array<i32>} : memref<1x8x128xf32, #tpu.memory_space<vmem>>, vector<1x8x128xf32>,
    return
  }
  func.func @transform_0(%arg0: i32) -> (i32, i32) {
    %c0_i32 = arith.constant 0 : i32
    %c0_i32_0 = arith.constant 0 : i32
    %c0_i32_1 = arith.constant 0 : i32
    return %c0_i32, %c0_i32_0 : i32, i32
  }
  func.func @transform_1(%arg0: i32) -> (i32, i32, i32) {
    %c0_i32 = arith.constant 0 : i32
    %c0_i32_0 = arith.constant 0 : i32
    %c0_i32_1 = arith.constant 0 : i32
    %c0_i32_2 = arith.constant 0 : i32
    return %c0_i32, %c0_i32_0, %c0_i32_1 : i32, i32, i32
  }
  func.func @transform_2(%arg0: i32) -> (i32, i32, i32) {
    %c0_i32 = arith.constant 0 : i32
    %c0_i32_0 = arith.constant 0 : i32
    %c0_i32_1 = arith.constant 0 : i32
    %c0_i32_2 = arith.constant 0 : i32
    return %c0_i32, %c0_i32_0, %c0_i32_1 : i32, i32, i32
  }
  func.func @transform_3(%arg0: i32) -> (i32, i32, i32) {
    %c0_i32 = arith.constant 0 : i32
    %c0_i32_0 = arith.constant 0 : i32
    %c0_i32_1 = arith.constant 0 : i32
    %c0_i32_2 = arith.constant 0 : i32
    return %c0_i32, %c0_i32_0, %c0_i32_1 : i32, i32, i32
  }
  func.func @transform_4(%arg0: i32) -> (i32, i32, i32) {
    %c0_i32 = arith.constant 0 : i32
    %c0_i32_0 = arith.constant 0 : i32
    %c0_i32_1 = arith.constant 0 : i32
    %c0_i32_2 = arith.constant 0 : i32
    return %c0_i32, %c0_i32_0, %c0_i32_1 : i32, i32, i32
  }
  func.func @transform_5(%arg0: i32) -> (i32, i32, i32) {
    %c0_i32 = arith.constant 0 : i32
    %c0_i32_0 = arith.constant 0 : i32
    %c0_i32_1 = arith.constant 0 : i32
    %c0_i32_2 = arith.constant 0 : i32
    return %c0_i32, %c0_i32_0, %c0_i32_1 : i32, i32, i32
  }
  func.func @transform_6(%arg0: i32) -> (i32, i32, i32) {
    %c0_i32 = arith.constant 0 : i32
    %c0_i32_0 = arith.constant 0 : i32
    %c0_i32_1 = arith.constant 0 : i32
    %c0_i32_2 = arith.constant 0 : i32
    return %c0_i32, %c0_i32_0, %c0_i32_1 : i32, i32, i32
  }
  func.func @transform_7(%arg0: i32) -> (i32, i32, i32) {
    %c0_i32 = arith.constant 0 : i32
    %c0_i32_0 = arith.constant 0 : i32
    %c0_i32_1 = arith.constant 0 : i32
    %c0_i32_2 = arith.constant 0 : i32
    return %c0_i32, %c0_i32_0, %c0_i32_1 : i32, i32, i32
  }
  func.func @transform_8(%arg0: i32) -> (i32, i32, i32) {
    %c0_i32 = arith.constant 0 : i32
    %c0_i32_0 = arith.constant 0 : i32
    %c0_i32_1 = arith.constant 0 : i32
    return %arg0, %c0_i32, %c0_i32_0 : i32, i32, i32
  }
  func.func @transform_9(%arg0: i32) -> (i32, i32, i32) {
    %c0_i32 = arith.constant 0 : i32
    %c0_i32_0 = arith.constant 0 : i32
    %c0_i32_1 = arith.constant 0 : i32
    return %arg0, %c0_i32, %c0_i32_0 : i32, i32, i32
  }
}

</mosaic_0001>

<bundles_post_ra>
// kernel: temporal_conv_net_forward.7
= control target key start
LH: loop header
LB: loop body
LE: loop exit
PB: predicated region body
PF: predicated region fallthrough
CT: control target
= control target key end

     0   :  { %s316_s9 = smov 0   ;;  %s336_s0 = inlined_call_operand.vmem [shape: bf16[16,8], index: 0, kind: input, shape index: {}]   ;;  %s337_s1 = inlined_call_operand.vmem [shape: f32[2,8,128], index: 1, kind: input, shape index: {}]   ;;  %s338_s2 = inlined_call_operand.vmem [shape: f32[2,16,128], index: 2, kind: output, shape index: {}]  }
   0x1 LB: > { %s259_s10 = sadd.s32 4294967295, %s297_s9   ;;  %p263_p0 = scmp.ge.s32.totalorder %s297_s9, 1  ;;  %s297_s9 = sphi %s316_s9, %s12_s9  }
   0x2   : > { %p111_p1 = scmp.lt.s32.totalorder %s297_s9, 3 }
   0x4   : > { %p112_p2 = pnand %p263_p0, %p111_p1 }
   0x5   : > { %p132_p3 = scmp.lt.s32.totalorder (!%p112_p2), %s259_s10, 1  ;;  %v299_v0 = vmov (!%p112_p2), 0.0   ;;  %vm300_vm0 = vmmov (!%p112_p2), 0   ;;  %vm155_vm1 = vcmask (!%p112_p2), 1043456   ;;  %v290_v4 = vld [vmem:[%s336_s0] sm:$0xff] (!%p112_p2)   ;;  %vm151_vm2 = vcmask (!%p112_p2), 64512  }
   0x6   : > { %115 = sbr.rel (%p112_p2) target bundleno = 240 (0xf0), region = 28  ;;  %274 = vmatprep.subr.bf16.mxu0 (!%p112_p2), %v299_v0  ;;  %276 = vmatprep.mubr.msk.bf16.mxu0 (!%p112_p2), %vm300_vm0, %v299_v0 }
   0xd   : > { %s340_s10 = smov (!%p132_p3, %s259_s10), 1 }
   0xe   : > { %s264_s11 = sshll.u32 %s340_s10, 3  ;;  %s271_s17 = sshll.u32 %s340_s10, 4 }
   0xf   : > { %s135_s14 = scalar_lea.vmem %s337_s1, %s264_s11  ;;  %s140_s20 = scalar_lea.vmem %s338_s2, %s271_s17 }
  0x10   : > { %v144_v1 = vld [vmem:[%s135_s14] sm:$0xff] }
  0x11   : > { %v145_v2 = vpack.c.bf16 %v144_v1, %v144_v1 }
  0x13   : > { %v157_v3 = vsel %vm155_vm1, %v145_v2, 0 }
  0x14   : > { %275 = vmatpush3.bf16.msra.mxu0 %v157_v3 }
  0x17   : > { %277 = vmatmul.mubr.msk.bf16.vlgmr.msra.gmra.mrb[0].mxu0 %vm151_vm2, %v290_v4 }
  0xea   : > { %v193_v5 = vpop.f32.mrb[0].mxu0 }
  0xeb   : > { %v200_v6 = vmax.f32 %v193_v5, 0.0  ;;  %v278_v7 = vpop.f32.mrb[1].mxu0 }
  0xec   : > { %v196_v8 = vpop.f32.mrb[2].mxu0 }
  0xed   : > { %202 = vst [vmem:[%s140_s20] sm:$0xff] %v200_v6  ;;  %v201_v9 = vmax.f32 %v196_v8, 0.0  ;;  %v279_v10 = vpop.f32.mrb[3].mxu0 }
  0xef   : > { %203 = vst [vmem:[%s140_s20 + $0x8] sm:$0xff] %v201_v9 }
  0xf0 PF: > { %s12_s9 = sadd.s32 1, %s297_s9  }
  0xf1   : > { %p9_p4 = scmp.ge.s32.totalorder %s12_s9, 4  }
  0xf3   :  { %11 = sbr.rel (!%p9_p4) target bundleno = 1 (0x1), region = 58 }

// kernel: temporal_conv_net_forward.4
= control target key start
LH: loop header
LB: loop body
LE: loop exit
PB: predicated region body
PF: predicated region fallthrough
CT: control target
= control target key end

     0   :  { %s411_s15 = smov 0   ;;  %s444_s0 = inlined_call_operand.vmem [shape: bf16[8,8], index: 0, kind: input, shape index: {}]   ;;  %s445_s1 = inlined_call_operand.vmem [shape: f32[1,8,1], index: 1, kind: input, shape index: {}]   ;;  %s446_s2 = inlined_call_operand.vmem [shape: f32[1,8,1], index: 2, kind: input, shape index: {}]   ;;  %s447_s3 = inlined_call_operand.vmem [shape: f32[2,8,128], index: 3, kind: input, shape index: {}]   ;;  %s448_s4 = inlined_call_operand.vmem [shape: f32[2,8,128], index: 4, kind: output, shape index: {}]  }
   0x1 LB: > { %s342_s16 = sadd.s32 4294967295, %s381_s15   ;;  %p346_p0 = scmp.ge.s32.totalorder %s381_s15, 1  ;;  %s381_s15 = sphi %s411_s15, %s14_s15  }
   0x2   : > { %p161_p1 = scmp.lt.s32.totalorder %s381_s15, 3 }
   0x4   : > { %p162_p2 = pnand %p346_p0, %p161_p1 }
   0x5   : > { %v214_v0 = vld [vmem:[%s445_s1] sm:$0xff] (!%p162_p2)  ;;  %v383_v1 = vmov (!%p162_p2), 0   ;;  %v384_v3 = vmov (!%p162_p2), 0.0   ;;  %vm385_vm0 = vmmov (!%p162_p2), 0   ;;  %p185_p3 = scmp.lt.s32.totalorder (!%p162_p2), %s342_s16, 1  ;;  %v232_v24 = vlaneseq (!%p162_p2) }
   0x6   : > { %165 = sbr.rel (%p162_p2) target bundleno = 364 (0x16c), region = 36  ;;  %372 = vset.pattern.permute.xlu0 (!%p162_p2), %v383_v1  ;;  %v225_v2 = vld [vmem:[%s446_s2] sm:$0xff] (!%p162_p2)  ;;  %355 = vmatprep.subr.bf16.mxu0 (!%p162_p2), %v384_v3  ;;  %vm244_vm2 = vcmask (!%p162_p2), 1043456   ;;  %vm240_vm3 = vcmask (!%p162_p2), 64512  }
   0x7   : > { %218 = vperm.xlu0 (!%p162_p2), %372, %v214_v0   ;;  %357 = vmatprep.mubr.msk.bf16.mxu0 (!%p162_p2), %vm385_vm0, %v384_v3  ;;  %v233_v26 = vand.u32 (!%p162_p2), 127, %v232_v24  ;;  %v238_v37 = vld [vmem:[%s444_s0] sm:$0xf] (!%p162_p2) }
   0x9   : > { %vm234_vm1 = vcmp.lt.s32.totalorder (!%p162_p2), %v233_v26, 16 }
   0xa   : > { %v349_v32 = vsel (!%p162_p2), %vm234_vm1, 1.0, %v384_v3 }
   0xb   : > { %228 = vperm.xlu0 (!%p162_p2), %372, %v225_v2  }
   0xd   : > { %s450_s16 = smov (!%p185_p3, %s342_s16), 1 }
   0xe   : > { %s347_s21 = sshll.u32 %s450_s16, 3 }
   0xf   : > { %s188_s24 = scalar_lea.vmem %s447_s3, %s347_s21  ;;  %s192_s29 = scalar_lea.vmem %s448_s4, %s347_s21 }
  0x10   : > { %v194_v4 = vld [vmem:[%s188_s24] sm:$0xff] }
  0x11   : > { %v195_v5 = vrot.slane %v194_v4, 4  ;;  %v203_v6 = vmul.f32 %v194_v4, %v194_v4 }
  0x13   : > { %v196_v7 = vadd.f32 %v195_v5, %v194_v4  ;;  %v204_v8 = vrot.slane %v203_v6, 4 }
  0x15   : > { %v197_v9 = vrot.slane %v196_v7, 2  ;;  %v205_v10 = vadd.f32 %v204_v8, %v203_v6 }
  0x17   : > { %v198_v11 = vadd.f32 %v197_v9, %v196_v7  ;;  %v206_v12 = vrot.slane %v205_v10, 2 }
  0x19   : > { %v199_v13 = vrot.slane %v198_v11, 1  ;;  %v207_v14 = vadd.f32 %v206_v12, %v205_v10 }
  0x1b   : > { %v200_v15 = vadd.f32 %v199_v13, %v198_v11  ;;  %v208_v16 = vrot.slane %v207_v14, 1 }
  0x1d   : > { %v202_v17 = vmul.f32 0.125, %v200_v15  ;;  %v209_v18 = vadd.f32 %v208_v16, %v207_v14 }
  0x1f   : > { %v210_v19 = vmul.f32 0.125, %v209_v18  ;;  %v211_v20 = vmul.f32 %v202_v17, %v202_v17  ;;  %v215_v25 = vsub.f32 %v194_v4, %v202_v17 }
  0x21   : > { %v212_v21 = vsub.f32 %v210_v19, %v211_v20 }
  0x23   : > { %v213_v22 = vmax.f32 %v212_v21, 0.0 }
  0x25   : > { %v222_v23 = vadd.f32 1.1920929e-07, %v213_v22 }
  0x27   : > { %373 = vrsqrt.f32 %v222_v23 }
  0x31   : > { %v374_v27 = vpop.eup %373 }
  0x86   : > { %v219_v28 = vpop.permute.xlu0 %218 }
  0x87   : > { %v221_v29 = vmul.f32 %v219_v28, %v215_v25 }
  0x89   : > { %v224_v30 = vmul.f32 %v374_v27, %v221_v29 }
  0x8a   : > { %v229_v31 = vpop.permute.xlu0 %228 }
  0x8b   : > { %v231_v33 = vadd.f32 %v229_v31, %v224_v30 }
  0x8d   : > { %v237_v34 = vmul.f32 %v349_v32, %v231_v33 }
  0x8f   : > { %v239_v35 = vpack.c.bf16 %v237_v34, %v237_v34 }
  0x91   : > { %v246_v36 = vsel %vm244_vm2, %v239_v35, 0 }
  0x92   : > { %356 = vmatpush3.bf16.msra.mxu0 %v246_v36 }
  0x95   : > { %358 = vmatmul.mubr.msk.bf16.vlgmr.msra.gmra.mrb[0].mxu0 %vm240_vm3, %v238_v37 }
 0x168   : > { %v282_v38 = vpop.f32.mrb[0].mxu0 }
 0x169   : > { %288 = vst [vmem:[%s192_s29] sm:$0xff] %v282_v38  ;;  %v359_v39 = vpop.f32.mrb[1].mxu0 }
 0x16a   : > { %v285_v40 = vpop.f32.mrb[2].mxu0 }
 0x16b   : > { %v360_v41 = vpop.f32.mrb[3].mxu0 }
 0x16c PF: > { %s14_s15 = sadd.s32 1, %s381_s15  }
 0x16d   : > { %p11_p4 = scmp.ge.s32.totalorder %s14_s15, 4  }
 0x16f   :  { %13 = sbr.rel (!%p11_p4) target bundleno = 1 (0x1), region = 66 }

// kernel: temporal_conv_net_forward.5
= control target key start
LH: loop header
LB: loop body
LE: loop exit
PB: predicated region body
PF: predicated region fallthrough
CT: control target
= control target key end

     0   :  { %14 = vsyncpa [#allocation3], 0  ;;  %s1112_s30 = smov 0   ;;  %s1263_s0 = inlined_call_operand.vmem [shape: f32[2,2], index: 0, kind: input, shape index: {}]   ;;  %s1264_s1 = inlined_call_operand.vmem [shape: bf16[2,8,8], index: 1, kind: input, shape index: {}]   ;;  %s1265_s2 = inlined_call_operand.vmem [shape: f32[2,8,1], index: 2, kind: input, shape index: {}]   ;;  %s1266_s3 = inlined_call_operand.vmem [shape: f32[2,8,1], index: 3, kind: input, shape index: {}]   ;;  %s1267_s4 = inlined_call_operand.vmem [shape: f32[2,8,3], index: 4, kind: input, shape index: {}]   ;;  %s1268_s5 = inlined_call_operand.vmem [shape: f32[2,8,1], index: 5, kind: input, shape index: {}]   ;;  %s1269_s6 = inlined_call_operand.vmem [shape: f32[2,8,1], index: 6, kind: input, shape index: {}]   ;;  %s1270_s7 = inlined_call_operand.vmem [shape: bf16[2,8,8], index: 7, kind: input, shape index: {}]   ;;  %s1271_s8 = inlined_call_operand.vmem [shape: f32[2,8,128], index: 8, kind: input, shape index: {}, may-alias: {8,9}]   ;;  %s1272_s9 = inlined_call_operand.vmem [shape: f32[2,8,128], index: 9, kind: output, shape index: {}, may-alias: {8,9}]  }
   0x1 LB: > { %s1118_s10 = sadd.s32 4294967295, %s1049_s30   ;;  %p894_p0 = scmp.ge.s32.totalorder %s1049_s30, 1  ;;  %s1049_s30 = sphi %s1112_s30, %s20_s30  }
   0x2   : > { %p245_p1 = scmp.lt.s32.totalorder %s1049_s30, 3  ;;  %s258_s13 = sshll.u32 %s1263_s0, 4  ;;  %s259_s13 = int_to_ptr.vmem [resolvable:$true] %s258_s13 }
   0x3   : > { %p986_p3 = scmp.eq.s32.totalorder %s1118_s10, 0  ;;  %s1024_s15 = scalar_lea.vmem %s259_s13, 32 }
   0x4   : > { %p1125_p2 = pnand %p894_p0, %p245_p1  ;;  %p1025_p6 = scmp.ne.s32.totalorder %s259_s13, %s1024_s15 }
   0x5   : > { %p1032_p10 = scmp.lt.s32.totalorder %s259_s13, %s259_s13  ;;  %p1033_p11 = scmp.lt.s32.totalorder %s1024_s15, %s1024_s15 }
   0x6   : > { %p982_p4 = pneg %p1125_p2 }
   0x7   : > { %p1034_p12 = por %p1033_p11, %p1032_p10 }
   0x8   : > { %p983_p5 = pnand %p986_p3, %p982_p4 }
   0xa   : > { %p1026_p7 = pneg %p983_p5 }
   0xc   : > { %p1027_p8 = pnand %p1026_p7, %p1025_p6 }
   0xe   : > { %p1028_p9 = pneg %p1027_p8 }
  0x10   : > { %p1035_p13 = pnand %p1034_p12, %p1028_p9 }
  0x12   : > { %1038 = shalt.err (!%p1035_p13)
}
  0x13   : > { %s1051_s16 = smov [#allocation2]   ;;  %299 = sbr.rel (%p1125_p2) target bundleno = 2839 (0xb17), region = 56 }
  0x14   : > { %985 = dma.vmem_to_smem (!%p983_p5), %s259_s13, 32, %s1051_s16, [#allocation3]  }
  0x1a   : > { %1044 = dma.done.wait (%p986_p3), [#allocation3], 32  }
  0x1b   : > { %1046 = vsyncadd (%p986_p3), [#allocation3], 4294967264 }
  0x1c   : > { %305 = sfence }
  0x1d   : > { %p334_p0 = scmp.lt.s32.totalorder %s1118_s10, 1  ;;  %v1052_v0 = vmov 0.0   ;;  %vm1053_vm0 = vmmov 0   ;;  %vm357_vm1 = vcmask 1043456   ;;  %v351_v4 = vld [vmem:[%s1264_s1] sm:$0xf]  ;;  %v344_v40 = vlaneseq }
  0x1e   : > { %930 = vmatprep.subr.bf16.mxu0 %v1052_v0  ;;  %932 = vmatprep.mubr.msk.bf16.mxu0 %vm1053_vm0, %v1052_v0  ;;  %vm353_vm2 = vcmask 64512   ;;  %s349_s23 = sld [smem:[#allocation2]]  ;;  %v1054_v23 = vmov 0   ;;  %v453_v28 = vld [vmem:[%s1267_s4] sm:$0xff]  ;;  %s1055_s13 = smov 0.0   ;;  %v1056_v38 = vmov 1  }
  0x1f   : > { %s1275_s10 = smov (!%p334_p0, %s1118_s10), 1  ;;  %936 = vmatprep.subr.bf16.mxu1 %v1052_v0  ;;  %938 = vmatprep.mubr.msk.bf16.mxu1 %vm1053_vm0, %v1052_v0  ;;  %v429_v31 = vld [vmem:[%s1265_s2] sm:$0xff]  ;;  %v1057_v39 = vmov 2   ;;  %v1183_v41 = vand.u32 127, %v344_v40  ;;  %s1058_s22 = smov 1  }
  0x20   : > { %s899_s17 = sshll.u32 %s1275_s10, 3  ;;  %1007 = vset.pattern.permute.xlu1 %v1054_v23  ;;  %1008 = vset.pattern.permute.xlu0 %v1054_v23  ;;  %v436_v35 = vld [vmem:[%s1266_s3] sm:$0xff]  ;;  %s902_s24 = sld [smem:[#allocation2 + $0x1]] }
  0x21   : > { %s337_s20 = scalar_lea.vmem %s1271_s8, %s899_s17  ;;  %vm346_vm4 = vcmp.lt.s32.totalorder %v1183_v41, 16  ;;  %vm456_vm5 = vcmp.ge.s32.totalorder %v1183_v41, 1  ;;  %vm474_vm6 = vcmp.lt.s32.totalorder %v1183_v41, 127  ;;  %vm694_vm9 = vcmp.ge.s32.totalorder %v1183_v41, 2 }
  0x22   : > { %v1156_v1 = vld [vmem:[%s337_s20] sm:$0xff]  ;;  %v1187_v44 = vsel %vm346_vm4, 1.0, %v1052_v0  ;;  %v904_v50 = vsel %vm456_vm5, 1.0, %v1052_v0  ;;  %v905_v54 = vsel %vm474_vm6, 1.0, %v1052_v0  ;;  %vm712_vm10 = vcmp.lt.s32.totalorder %v1183_v41, 126 }
  0x23   : > { %v352_v2 = vpack.c.bf16 %v1156_v1, %v1156_v1 }
  0x24   : > { %v402_v5 = vstv %s349_s23  ;;  %s1059_s23 = smov 127  }
  0x25   : > { %v359_v3 = vsel %vm357_vm1, %v352_v2, 0 }
  0x26   : > { %931 = vmatpush3.bf16.msra.mxu0 %v359_v3  ;;  %v485_v61 = vstv %s902_s24  ;;  %s1060_s24 = smov 2  }
  0x27   : > { %942 = vmatprep.subr.bf16.mxu0 %v1052_v0 }
  0x29   : > { %933 = vmatmul.mubr.msk.bf16.vlgmr.msra.gmra.mrb[0].mxu0 %vm353_vm2, %v351_v4 }
  0x2a   : > { %944 = vmatprep.mubr.msk.bf16.mxu0 %vm1053_vm0, %v1052_v0 }
  0xfc   : > { %v395_v6 = vpop.f32.mrb[0].mxu0 }
  0xfd   : > { %vm401_vm3 = vcmp.ge.f32.partialorder %v395_v6, 0.0  ;;  %v403_v7 = vmul.f32 %v402_v5, %v395_v6  ;;  %v934_v8 = vpop.f32.mrb[1].mxu0 }
  0xfe   : > { %v398_v9 = vpop.f32.mrb[2].mxu0 }
  0xff   : > { %v935_v10 = vpop.f32.mrb[3].mxu0  ;;  %v404_v11 = vsel %vm401_vm3, %v395_v6, %v403_v7 }
 0x100   : > { %405 = vadd.xlane.f32.xlu0 %v404_v11  ;;  %v415_v12 = vmul.f32 %v404_v11, %v404_v11 }
 0x104   : > { %416 = vadd.xlane.f32.xlu0 %v415_v12 }
 0x11a   : > { %462 = vperm.xlu0 %1008, %v453_v28  }
 0x18d   : > { %v406_v13 = vpop.xlane.xlu0 %405 }
 0x18e   : > { %v407_v14 = vrot.slane %v406_v13, 4 }
 0x190   : > { %v408_v15 = vadd.f32 %v407_v14, %v406_v13 }
 0x191   : > { %v417_v16 = vpop.xlane.xlu0 %416 }
 0x192   : > { %v409_v17 = vrot.slane %v408_v15, 2  ;;  %v418_v18 = vrot.slane %v417_v16, 4 }
 0x194   : > { %v419_v19 = vadd.f32 %v418_v18, %v417_v16  ;;  %v410_v20 = vadd.f32 %v409_v17, %v408_v15 }
 0x196   : > { %v420_v21 = vrot.slane %v419_v19, 2  ;;  %v411_v22 = vrot.slane %v410_v20, 1 }
 0x198   : > { %v412_v24 = vadd.f32 %v411_v22, %v410_v20  ;;  %v421_v25 = vadd.f32 %v420_v21, %v419_v19  ;;  %v513_v21 = vld [vmem:[%s1268_s5] sm:$0xff] }
 0x199   : > { %v463_v52 = vpop.permute.xlu0 %462 }
 0x19a   : > { %954 = vpush %v412_v24  ;;  %v422_v26 = vrot.slane %v421_v25, 1 }
 0x19c   : > { %v423_v27 = vadd.f32 %v422_v26, %v421_v25  ;;  %v520_v26 = vld [vmem:[%s1269_s6] sm:$0xff] }
 0x19e   : > { %956 = vpush %v423_v27 }
 0x1cb   : > { %s955_s26 = spop %954 }
 0x1cc   : > { %s414_s27 = smul.f32 0.0078125, %s955_s26 }
 0x1ce   : > { %s426_s28 = smul.f32 %s414_s27, %s414_s27  ;;  %v437_v34 = vstv %s414_s27 }
 0x1cf   : > { %s957_s29 = spop %956 }
 0x1d0   : > { %s425_s11 = smul.f32 0.0078125, %s957_s29 }
 0x1d2   : > { %s427_s12 = ssub.f32 %s425_s11, %s426_s28 }
 0x1d4   : > { %s428_s14 = smax.f32 %s1055_s13, %s427_s12 }
 0x1d5   : > { %s430_s15 = sadd.f32 1.1920929e-07, %s428_s14 }
 0x1d7   : > { %v431_v29 = vstv %s430_s15 }
 0x1d8   : > { %1016 = vrsqrt.f32 %v431_v29 }
 0x1e2   : > { %v1017_v30 = vpop.eup %1016 }
 0x1e3   : > { %958 = vpush %v1017_v30 }
 0x214   : > { %s959_s19 = spop %958 }
 0x215   : > { %v434_v32 = vstv %s959_s19 }
 0x216   : > { %v435_v33 = vmul.f32 %v434_v32, %v429_v31 }
 0x218   : > { %442 = vperm.xlu1 %1007, %v435_v33   ;;  %v438_v36 = vmul.f32 %v437_v34, %v435_v33 }
 0x21a   : > { %v439_v37 = vsub.f32 %v436_v35, %v438_v36  ;;  %v537_v36 = vld [vmem:[%s1270_s7] sm:$0xf] }
 0x21c   : > { %448 = vperm.xlu1 %1007, %v439_v37  }
 0x220   : > { %1009 = vset.pattern.permute.xlu1 %v1056_v38 }
 0x221   : > { %467 = vperm.xlu1 %1009, %v453_v28  }
 0x225   : > { %1010 = vset.pattern.permute.xlu1 %v1057_v39 }
 0x226   : > { %479 = vperm.xlu1 %1010, %v453_v28  }
 0x22a   : > { %1011 = vset.pattern.permute.xlu1 %v1054_v23 }
 0x297   : > { %v443_v42 = vpop.permute.xlu1 %442 }
 0x298   : > { %v445_v43 = vmul.f32 %v443_v42, %v404_v11 }
 0x29b   : > { %v449_v45 = vpop.permute.xlu1 %448 }
 0x29c   : > { %v451_v46 = vadd.f32 %v449_v45, %v445_v43 }
 0x29e   : > { %v452_v47 = vmul.f32 %v1187_v44, %v451_v46 }
 0x2a0   : > { %454 = vrot.lane.b32.xlu1 %v452_v47, %s1058_s22  ;;  %v468_v48 = vpop.permute.xlu1 %467 }
 0x2a1   : > { %v470_v57 = vmul.f32 %v468_v48, %v452_v47 }
 0x2a4   : > { %472 = vrot.lane.b32.xlu1 %v452_v47, %s1059_s23  ;;  %v909_v47 = vld [vmem:[%s1264_s1 + $0x4] sm:$0xf] }
 0x2a5   : > { %v480_v49 = vpop.permute.xlu1 %479 }
 0x312   : > { %v455_v51 = vpop.permute.xlu1 %454 }
 0x313   : > { %v459_v53 = vmul.f32 %v904_v50, %v455_v51 }
 0x315   : > { %v465_v55 = vmul.f32 %v463_v52, %v459_v53 }
 0x316   : > { %v473_v56 = vpop.permute.xlu1 %472 }
 0x317   : > { %v477_v58 = vmul.f32 %v905_v54, %v473_v56  ;;  %v471_v59 = vadd.f32 %v470_v57, %v465_v55 }
 0x319   : > { %v482_v60 = vmul.f32 %v480_v49, %v477_v58 }
 0x31b   : > { %v483_v62 = vadd.f32 %v482_v60, %v471_v59 }
 0x31d   : > { %vm484_vm7 = vcmp.ge.f32.partialorder %v483_v62, 0.0  ;;  %v486_v63 = vmul.f32 %v485_v61, %v483_v62 }
 0x31f   : > { %v487_v2 = vsel %vm484_vm7, %v483_v62, %v486_v63 }
 0x320   : > { %v488_v3 = vmul.f32 %v1187_v44, %v487_v2 }
 0x322   : > { %489 = vadd.xlane.f32.xlu1 %v488_v3  ;;  %v499_v4 = vmul.f32 %v488_v3, %v488_v3 }
 0x324   : > { %500 = vadd.xlane.f32.xlu0 %v499_v4 }
 0x3af   : > { %v490_v5 = vpop.xlane.xlu1 %489 }
 0x3b0   : > { %v491_v6 = vrot.slane %v490_v5, 4 }
 0x3b1   : > { %v501_v7 = vpop.xlane.xlu0 %500 }
 0x3b2   : > { %v492_v8 = vadd.f32 %v491_v6, %v490_v5  ;;  %v502_v9 = vrot.slane %v501_v7, 4 }
 0x3b4   : > { %v493_v10 = vrot.slane %v492_v8, 2  ;;  %v503_v11 = vadd.f32 %v502_v9, %v501_v7  ;;  %v913_v7 = vld [vmem:[%s1267_s4 + $0x8] sm:$0xff] }
 0x3b6   : > { %v504_v12 = vrot.slane %v503_v11, 2  ;;  %v494_v13 = vadd.f32 %v493_v10, %v492_v8  ;;  %v911_v10 = vld [vmem:[%s1265_s2 + $0x8] sm:$0xff] }
 0x3b8   : > { %v495_v14 = vrot.slane %v494_v13, 1  ;;  %v505_v15 = vadd.f32 %v504_v12, %v503_v11 }
 0x3ba   : > { %v496_v16 = vadd.f32 %v495_v14, %v494_v13  ;;  %v506_v17 = vrot.slane %v505_v15, 1  ;;  %v912_v14 = vld [vmem:[%s1266_s3 + $0x8] sm:$0xff] }
 0x3bc   : > { %960 = vpush %v496_v16  ;;  %v507_v18 = vadd.f32 %v506_v17, %v505_v15 }
 0x3be   : > { %962 = vpush %v507_v18 }
 0x3ed   : > { %s961_s25 = spop %960 }
 0x3ee   : > { %s498_s26 = smul.f32 0.0078125, %s961_s25  ;;  %s907_s25 = sld [smem:[#allocation2 + $0x80]] }
 0x3ef   : > { %s963_s27 = spop %962 }
 0x3f0   : > { %s510_s28 = smul.f32 %s498_s26, %s498_s26  ;;  %v521_v25 = vstv %s498_s26  ;;  %s908_s26 = sld [smem:[#allocation2 + $0x81]] }
 0x3f1   : > { %s509_s29 = smul.f32 0.0078125, %s963_s27 }
 0x3f3   : > { %s511_s11 = ssub.f32 %s509_s29, %s510_s28 }
 0x3f4   : > { %v637_v48 = vstv %s907_s25  ;;  %s1061_s25 = smov 126  }
 0x3f5   : > { %s512_s12 = smax.f32 %s1055_s13, %s511_s11 }
 0x3f6   : > { %s514_s14 = sadd.f32 1.1920929e-07, %s512_s12 }
 0x3f8   : > { %v515_v19 = vstv %s514_s14 }
 0x3f9   : > { %1018 = vrsqrt.f32 %v515_v19 }
 0x403   : > { %v1019_v20 = vpop.eup %1018 }
 0x404   : > { %964 = vpush %v1019_v20 }
 0x435   : > { %s965_s18 = spop %964 }
 0x436   : > { %v518_v22 = vstv %s965_s18 }
 0x437   : > { %v519_v24 = vmul.f32 %v518_v22, %v513_v21 }
 0x439   : > { %v522_v27 = vmul.f32 %v521_v25, %v519_v24  ;;  %526 = vperm.xlu1 %1011, %v519_v24  }
 0x43b   : > { %v523_v28 = vsub.f32 %v520_v26, %v522_v27  ;;  %v915_v26 = vsel %vm712_vm10, 1.0, %v1052_v0 }
 0x43d   : > { %532 = vperm.xlu1 %1011, %v523_v28  }
 0x441   : > { %1014 = vset.pattern.permute.xlu1 %v1057_v39 }
 0x4b8   : > { %v527_v29 = vpop.permute.xlu1 %526 }
 0x4b9   : > { %v529_v30 = vmul.f32 %v527_v29, %v487_v2 }
 0x4bc   : > { %v533_v31 = vpop.permute.xlu1 %532 }
 0x4bd   : > { %v535_v32 = vadd.f32 %v533_v31, %v529_v30 }
 0x4bf   : > { %v536_v33 = vmul.f32 %v1187_v44, %v535_v32 }
 0x4c1   : > { %v538_v34 = vpack.c.bf16 %v536_v33, %v536_v33 }
 0x4c3   : > { %v543_v35 = vsel %vm357_vm1, %v538_v34, 0  ;;  %v723_v34 = vstv %s908_s26  ;;  %s341_s26 = scalar_lea.vmem %s1272_s9, %s899_s17 }
 0x4c4   : > { %937 = vmatpush3.bf16.msra.mxu1 %v543_v35 }
 0x4c5   : > { %948 = vmatprep.subr.bf16.mxu1 %v1052_v0 }
 0x4c7   : > { %939 = vmatmul.mubr.msk.bf16.vlgmr.msra.gmra.mrb[0].mxu1 %vm353_vm2, %v537_v36 }
 0x4c8   : > { %950 = vmatprep.mubr.msk.bf16.mxu1 %vm1053_vm0, %v1052_v0 }
 0x59a   : > { %v579_v37 = vpop.f32.mrb[0].mxu1 }
 0x59b   : > { %v1213_v39 = vadd.f32 %v579_v37, %v1156_v1  ;;  %v940_v40 = vpop.f32.mrb[1].mxu1 }
 0x59c   : > { %v582_v42 = vpop.f32.mrb[2].mxu1 }
 0x59d   : > { %v589_v43 = vpack.c.bf16 %v1213_v39, %v1213_v39  ;;  %v941_v45 = vpop.f32.mrb[3].mxu1 }
 0x59f   : > { %v594_v46 = vsel %vm357_vm1, %v589_v43, 0 }
 0x5a0   : > { %943 = vmatpush3.bf16.msra.mxu0 %v594_v46 }
 0x5a3   : > { %945 = vmatmul.mubr.msk.bf16.vlgmr.msra.gmra.mrb[4].mxu0 %vm353_vm2, %v909_v47 }
 0x676   : > { %v630_v49 = vpop.f32.mrb[4].mxu0 }
 0x677   : > { %vm636_vm8 = vcmp.ge.f32.partialorder %v630_v49, 0.0  ;;  %v638_v1 = vmul.f32 %v637_v48, %v630_v49  ;;  %v946_v50 = vpop.f32.mrb[5].mxu0 }
 0x678   : > { %v633_v51 = vpop.f32.mrb[6].mxu0 }
 0x679   : > { %v947_v52 = vpop.f32.mrb[7].mxu0  ;;  %v639_v53 = vsel %vm636_vm8, %v630_v49, %v638_v1 }
 0x67a   : > { %640 = vadd.xlane.f32.xlu1 %v639_v53  ;;  %v650_v54 = vmul.f32 %v639_v53, %v639_v53 }
 0x67c   : > { %651 = vadd.xlane.f32.xlu0 %v650_v54 }
 0x68b   : > { %717 = vperm.xlu1 %1014, %v913_v7  }
 0x68f   : > { %1015 = vset.pattern.permute.xlu1 %v1054_v23 }
 0x707   : > { %v641_v55 = vpop.xlane.xlu1 %640 }
 0x708   : > { %v642_v56 = vrot.slane %v641_v55, 4 }
 0x709   : > { %v652_v57 = vpop.xlane.xlu0 %651 }
 0x70a   : > { %v643_v58 = vadd.f32 %v642_v56, %v641_v55  ;;  %v653_v59 = vrot.slane %v652_v57, 4 }
 0x70b   : > { %v718_v29 = vpop.permute.xlu1 %717 }
 0x70c   : > { %v644_v60 = vrot.slane %v643_v58, 2  ;;  %v654_v61 = vadd.f32 %v653_v59, %v652_v57  ;;  %v916_v57 = vld [vmem:[%s1268_s5 + $0x8] sm:$0xff] }
 0x70e   : > { %v655_v62 = vrot.slane %v654_v61, 2  ;;  %v645_v63 = vadd.f32 %v644_v60, %v643_v58 }
 0x710   : > { %v646_v2 = vrot.slane %v645_v63, 1  ;;  %v656_v3 = vadd.f32 %v655_v62, %v654_v61  ;;  %v917_v61 = vld [vmem:[%s1269_s6 + $0x8] sm:$0xff] }
 0x712   : > { %v647_v4 = vadd.f32 %v646_v2, %v645_v63  ;;  %v657_v5 = vrot.slane %v656_v3, 1 }
 0x714   : > { %966 = vpush %v647_v4  ;;  %v658_v6 = vadd.f32 %v657_v5, %v656_v3 }
 0x716   : > { %968 = vpush %v658_v6 }
 0x745   : > { %s967_s28 = spop %966 }
 0x746   : > { %s649_s29 = smul.f32 0.0078125, %s967_s28 }
 0x747   : > { %s969_s11 = spop %968 }
 0x748   : > { %s661_s12 = smul.f32 %s649_s29, %s649_s29  ;;  %v674_v13 = vstv %s649_s29 }
 0x749   : > { %s660_s14 = smul.f32 0.0078125, %s969_s11 }
 0x74b   : > { %s662_s15 = ssub.f32 %s660_s14, %s661_s12 }
 0x74d   : > { %s663_s16 = smax.f32 %s1055_s13, %s662_s15 }
 0x74e   : > { %s666_s18 = sadd.f32 1.1920929e-07, %s663_s16 }
 0x750   : > { %v667_v8 = vstv %s666_s18 }
 0x751   : > { %1020 = vrsqrt.f32 %v667_v8 }
 0x75b   : > { %v1021_v9 = vpop.eup %1020 }
 0x75c   : > { %970 = vpush %v1021_v9  ;;  %v918_v9 = vld [vmem:[%s1270_s7 + $0x4] sm:$0xf] }
 0x78d   : > { %s971_s21 = spop %970 }
 0x78e   : > { %v670_v11 = vstv %s971_s21 }
 0x78f   : > { %v671_v12 = vmul.f32 %v911_v10, %v670_v11 }
 0x791   : > { %v675_v15 = vmul.f32 %v674_v13, %v671_v12  ;;  %679 = vperm.xlu0 %1008, %v671_v12  }
 0x793   : > { %v676_v16 = vsub.f32 %v912_v14, %v675_v15 }
 0x795   : > { %685 = vperm.xlu0 %1008, %v676_v16  }
 0x799   : > { %1012 = vset.pattern.permute.xlu0 %v1056_v38  ;;  %v914_v38 = vsel %vm694_vm9, 1.0, %v1052_v0 }
 0x79a   : > { %705 = vperm.xlu0 %1012, %v913_v7  }
 0x79e   : > { %1013 = vset.pattern.permute.xlu0 %v1054_v23 }
 0x79f   : > { %700 = vperm.xlu0 %1013, %v913_v7  }
 0x810   : > { %v680_v17 = vpop.permute.xlu0 %679 }
 0x811   : > { %v682_v18 = vmul.f32 %v680_v17, %v639_v53 }
 0x814   : > { %v686_v19 = vpop.permute.xlu0 %685 }
 0x815   : > { %v688_v20 = vadd.f32 %v686_v19, %v682_v18 }
 0x817   : > { %v689_v21 = vmul.f32 %v1187_v44, %v688_v20 }
 0x819   : > { %692 = vrot.lane.b32.xlu0 %v689_v21, %s1060_s24  ;;  %v706_v22 = vpop.permute.xlu0 %705 }
 0x81a   : > { %v708_v30 = vmul.f32 %v706_v22, %v689_v21 }
 0x81d   : > { %710 = vrot.lane.b32.xlu0 %v689_v21, %s1061_s25 }
 0x81e   : > { %v701_v24 = vpop.permute.xlu0 %700 }
 0x88b   : > { %v693_v23 = vpop.permute.xlu0 %692 }
 0x88c   : > { %v697_v25 = vmul.f32 %v914_v38, %v693_v23 }
 0x88e   : > { %v703_v27 = vmul.f32 %v701_v24, %v697_v25 }
 0x88f   : > { %v711_v28 = vpop.permute.xlu0 %710 }
 0x890   : > { %v715_v31 = vmul.f32 %v915_v26, %v711_v28  ;;  %v709_v32 = vadd.f32 %v708_v30, %v703_v27 }
 0x892   : > { %v720_v33 = vmul.f32 %v718_v29, %v715_v31 }
 0x894   : > { %v721_v35 = vadd.f32 %v720_v33, %v709_v32 }
 0x896   : > { %vm722_vm11 = vcmp.ge.f32.partialorder %v721_v35, 0.0  ;;  %v724_v36 = vmul.f32 %v723_v34, %v721_v35 }
 0x898   : > { %v725_v37 = vsel %vm722_vm11, %v721_v35, %v724_v36 }
 0x899   : > { %v726_v40 = vmul.f32 %v1187_v44, %v725_v37 }
 0x89b   : > { %727 = vadd.xlane.f32.xlu0 %v726_v40  ;;  %v737_v41 = vmul.f32 %v726_v40, %v726_v40 }
 0x89d   : > { %738 = vadd.xlane.f32.xlu1 %v737_v41 }
 0x928   : > { %v728_v42 = vpop.xlane.xlu0 %727 }
 0x929   : > { %v729_v43 = vrot.slane %v728_v42, 4 }
 0x92a   : > { %v739_v0 = vpop.xlane.xlu1 %738 }
 0x92b   : > { %v730_v45 = vadd.f32 %v729_v43, %v728_v42  ;;  %v740_v46 = vrot.slane %v739_v0, 4 }
 0x92d   : > { %v731_v47 = vrot.slane %v730_v45, 2  ;;  %v741_v48 = vadd.f32 %v740_v46, %v739_v0 }
 0x92f   : > { %v742_v49 = vrot.slane %v741_v48, 2  ;;  %v732_v1 = vadd.f32 %v731_v47, %v730_v45 }
 0x931   : > { %v733_v50 = vrot.slane %v732_v1, 1  ;;  %v743_v51 = vadd.f32 %v742_v49, %v741_v48 }
 0x933   : > { %v734_v52 = vadd.f32 %v733_v50, %v732_v1  ;;  %v744_v53 = vrot.slane %v743_v51, 1 }
 0x935   : > { %972 = vpush %v734_v52  ;;  %v745_v54 = vadd.f32 %v744_v53, %v743_v51 }
 0x937   : > { %974 = vpush %v745_v54 }
 0x966   : > { %s973_s27 = spop %972 }
 0x967   : > { %s736_s28 = smul.f32 0.0078125, %s973_s27 }
 0x968   : > { %s975_s29 = spop %974 }
 0x969   : > { %s748_s11 = smul.f32 %s736_s28, %s736_s28  ;;  %v761_v60 = vstv %s736_s28 }
 0x96a   : > { %s747_s12 = smul.f32 0.0078125, %s975_s29 }
 0x96c   : > { %s749_s14 = ssub.f32 %s747_s12, %s748_s11 }
 0x96e   : > { %s750_s15 = smax.f32 %s1055_s13, %s749_s14 }
 0x96f   : > { %s753_s16 = sadd.f32 1.1920929e-07, %s750_s15 }
 0x971   : > { %v754_v55 = vstv %s753_s16 }
 0x972   : > { %1022 = vrsqrt.f32 %v754_v55 }
 0x97c   : > { %v1023_v56 = vpop.eup %1022 }
 0x97d   : > { %976 = vpush %v1023_v56 }
 0x9ae   : > { %s977_s20 = spop %976 }
 0x9af   : > { %v757_v58 = vstv %s977_s20 }
 0x9b0   : > { %v758_v59 = vmul.f32 %v916_v57, %v757_v58 }
 0x9b2   : > { %v762_v62 = vmul.f32 %v761_v60, %v758_v59  ;;  %766 = vperm.xlu0 %1013, %v758_v59  }
 0x9b4   : > { %v763_v63 = vsub.f32 %v917_v61, %v762_v62 }
 0x9b6   : > { %772 = vperm.xlu1 %1015, %v763_v63  }
 0xa31   : > { %v767_v2 = vpop.permute.xlu0 %766 }
 0xa32   : > { %v769_v3 = vmul.f32 %v767_v2, %v725_v37 }
 0xa35   : > { %v773_v4 = vpop.permute.xlu1 %772 }
 0xa36   : > { %v775_v5 = vadd.f32 %v773_v4, %v769_v3 }
 0xa38   : > { %v776_v6 = vmul.f32 %v1187_v44, %v775_v5 }
 0xa3a   : > { %v779_v7 = vpack.c.bf16 %v776_v6, %v776_v6 }
 0xa3c   : > { %v784_v8 = vsel %vm357_vm1, %v779_v7, 0 }
 0xa3d   : > { %949 = vmatpush3.bf16.msra.mxu1 %v784_v8 }
 0xa40   : > { %951 = vmatmul.mubr.msk.bf16.vlgmr.msra.gmra.mrb[4].mxu1 %vm353_vm2, %v918_v9 }
 0xb13   : > { %v820_v10 = vpop.f32.mrb[4].mxu1 }
 0xb14   : > { %v821_v11 = vadd.f32 %v820_v10, %v1213_v39  ;;  %v952_v12 = vpop.f32.mrb[5].mxu1 }
 0xb15   : > { %v823_v44 = vpop.f32.mrb[6].mxu1 }
 0xb16   : > { %826 = vst [vmem:[%s341_s26] sm:$0xff] %v821_v11  ;;  %v953_v13 = vpop.f32.mrb[7].mxu1 }
 0xb17 PF: > { %s20_s30 = sadd.s32 1, %s1049_s30  }
 0xb18   : > { %p17_p1 = scmp.ge.s32.totalorder %s20_s30, 4  }
 0xb1a   :  { %19 = sbr.rel (!%p17_p1) target bundleno = 1 (0x1), region = 98 }
 0xb21   :  { %846 = vsyncpa [#allocation3], 1 }
 0xb22   :  { %848 = vsyncpa [#allocation3 + $0x1], 1 }

</bundles_post_ra>
